<compile_context>
chip_gen: v5e
topology: v5e:2x2
jax: 0.10.0
libtpu: 0.0.40
codegen_flags: <defaults>
</compile_context>

<pallas_src>
import jax
import jax.numpy as jnp
from jax import lax
from jax.experimental import pallas as pl
from jax.experimental.pallas import tpu as pltpu


def _round_up(x, m):
    return ((x + m - 1) // m) * m


def _lm_kernel(ids_ref, w1f_ref, b1_ref, w2_ref, b2_ref, o_ref):
    """One batch tile of the fused forward pass.

    ids: (tb, C) int32   token ids for tb contexts
    w1f: (C, Vp, Hp)     embedding-fused linear1 weight (emb @ W1[c])
    b1:  (1, Hp)         f32
    w2:  (Hp, Vp)
    b2:  (1, Vp)         f32 (-1e30 on padded vocab columns)
    o:   (tb, Vp)        f32 log-probs
    """
    ids = ids_ref[...]
    tb, C = ids.shape
    Vp = w1f_ref.shape[1]
    Hp = b1_ref.shape[-1]
    wdt = w1f_ref.dtype  # MXU input dtype (f32 or bf16); accumulation is f32

    # Embedding gather fused as one-hot @ (emb @ W1[c]): pure MXU work, no XLA
    # gather, and the per-context partial dots accumulate straight into the
    # hidden activation (full 128-lane output width per matmul).
    vocab_iota = lax.broadcasted_iota(jnp.int32, (tb, Vp), 1)

    h = jnp.zeros((tb, Hp), jnp.float32)
    for c in range(C):  # C is small and static -> fully unrolled
        onehot = (ids[:, c:c + 1] == vocab_iota).astype(wdt)            # (tb, Vp)
        h = h + jnp.dot(onehot, w1f_ref[c],
                        preferred_element_type=jnp.float32)             # (tb, Hp)

    h = jnp.maximum(h + b1_ref[...].astype(jnp.float32), 0.0)           # ReLU

    logits = jnp.dot(h.astype(wdt), w2_ref[...],
                     preferred_element_type=jnp.float32)
    logits = logits + b2_ref[...].astype(jnp.float32)                   # (tb, Vp)

    # log_softmax over the vocab (lane) axis, numerically stable, kept in f32.
    m = jnp.max(logits, axis=-1, keepdims=True)
    z = logits - m
    lse = jnp.log(jnp.sum(jnp.exp(z), axis=-1, keepdims=True))
    o_ref[...] = (z - lse).astype(o_ref.dtype)


def language_modeler_forward(inputs, emb_table, w1, b1, w2, b2,
                             *, block_b=128, compute_dtype=jnp.float32):
    """Forward pass.

    inputs: (C,) int32  -> returns (1, V)  (single context, PyTorch semantics)
            (B, C) int32 -> returns (B, V) (batched contexts, row-wise identical)
    w1: linear1 weight in x @ W layout, shape (C*E, H).
    compute_dtype: jnp.float32 (semantics-faithful) or jnp.bfloat16 (v6e/v7x
    MXU-native input width; accumulation stays f32, biases/log-softmax stay f32).
    """
    single = inputs.ndim == 1
    ids = inputs[None, :] if single else inputs
    ids = ids.astype(jnp.int32)
    B, C = ids.shape
    V, E = emb_table.shape
    H = w2.shape[0]
    assert w1.shape == (C * E, H)
    assert w2.shape == (H, V)

    Vp = _round_up(V, 128)
    Hp = _round_up(H, 128)

    # Fuse the embedding lookup into linear1 (selection commutes with matmul):
    #   W1f[c] = emb @ W1[c]   with W1 reshaped (C, E, H)  ->  (C, V, H)
    # Done once per call in f32, then cast to the MXU input dtype.
    w1_r = w1.reshape(C, E, H)
    w1f = jnp.einsum('ve,ceh->cvh',
                     emb_table.astype(jnp.float32),
                     w1_r.astype(jnp.float32))                           # (C, V, H)

    b1p = jnp.asarray(b1, jnp.float32).reshape(1, H)
    b2p = jnp.asarray(b2, jnp.float32).reshape(1, V)
    w2p = jnp.asarray(w2, jnp.float32)

    if Hp != H:                                    # zero-pad hidden dim (exact)
        w1f = jnp.pad(w1f, ((0, 0), (0, 0), (0, Hp - H)))
        b1p = jnp.pad(b1p, ((0, 0), (0, Hp - H)))
        w2p = jnp.pad(w2p, ((0, Hp - H), (0, 0)))
    if Vp != V:                                    # pad vocab; mask via bias
        w1f = jnp.pad(w1f, ((0, 0), (0, Vp - V), (0, 0)))
        w2p = jnp.pad(w2p, ((0, 0), (0, Vp - V)))
        b2p = jnp.pad(b2p, ((0, 0), (0, Vp - V)), constant_values=-1e30)

    # Batch tile: at least 8 rows (f32 sublane minimum), up to block_b.
    tb = min(block_b, _round_up(B, 8))
    Bp = _round_up(B, tb)
    if Bp != B:
        ids = jnp.pad(ids, ((0, Bp - B), (0, 0)))  # padded rows use token id 0

    w1f_c = w1f.astype(compute_dtype)
    w2_c = w2p.astype(compute_dtype)

    out = pl.pallas_call(
        _lm_kernel,
        out_shape=jax.ShapeDtypeStruct((Bp, Vp), jnp.float32),
        grid=(Bp // tb,),
        in_specs=[
            pl.BlockSpec((tb, C), lambda i: (i, 0)),        # ids: tiled over batch
            # Weights: constant index_maps -> DMA'd once, VMEM-resident for the
            # whole batch grid (well under the scoped VMEM limit).
            pl.BlockSpec((C, Vp, Hp), lambda i: (0, 0, 0)),
            pl.BlockSpec((1, Hp), lambda i: (0, 0)),
            pl.BlockSpec((Hp, Vp), lambda i: (0, 0)),
            pl.BlockSpec((1, Vp), lambda i: (0, 0)),
        ],
        out_specs=pl.BlockSpec((tb, Vp), lambda i: (i, 0)),
        compiler_params=pltpu.CompilerParams(
            # Batch rows are independent -> megacore / 2-TC sharding on v7x.
            dimension_semantics=("parallel",),
        ),
    )(ids, w1f_c, b1p, w2_c, b2p)

    return out[:B, :V]  # (B, V); (1, V) for a single-context input


def _ref_forward(ids, emb_table, w1, b1, w2, b2):
    """Pure-JAX reference (mirrors the PyTorch module, batched over rows)."""
    x = jnp.take(emb_table, ids, axis=0).reshape(ids.shape[0], -1)  # (B, C*E)
    h = jnp.maximum(x @ w1 + b1, 0.0)
    logits = h @ w2 + b2
    return jax.nn.log_softmax(logits, axis=-1)


def init_params(key, vocab_size, embedding_dim, context_size, hidden_size=128):
    """Deterministic synthetic parameters (PyTorch-style init, x @ W layout)."""
    k_emb, k_w1, k_b1, k_w2, k_b2 = jax.random.split(key, 5)
    in1 = context_size * embedding_dim

    emb_table = jax.random.normal(k_emb, (vocab_size, embedding_dim), jnp.float32)

    lim1 = 1.0 / jnp.sqrt(in1)
    w1 = jax.random.uniform(k_w1, (in1, hidden_size), jnp.float32, -lim1, lim1)
    b1 = jax.random.uniform(k_b1, (1, hidden_size), jnp.float32, -lim1, lim1)

    lim2 = 1.0 / jnp.sqrt(hidden_size)
    w2 = jax.random.uniform(k_w2, (hidden_size, vocab_size), jnp.float32, -lim2, lim2)
    b2 = jax.random.uniform(k_b2, (1, vocab_size), jnp.float32, -lim2, lim2)

    return emb_table, w1, b1, w2, b2


if __name__ == "__main__":
    # Lane-dense, small shapes: C*E = 128, H = 128 (PyTorch default), V = 128.
    vocab_size, embedding_dim, context_size, hidden_size = 128, 16, 8, 128
    batch = 256  # two 128-row batch tiles -> grid=(2,), "parallel" axis

    key = jax.random.PRNGKey(0)
    k_params, k_inputs = jax.random.split(key)
    emb_table, w1, b1, w2, b2 = init_params(
        k_params, vocab_size, embedding_dim, context_size, hidden_size
    )
    ids = jax.random.randint(
        k_inputs, (batch, context_size), 0, vocab_size, jnp.int32
    )

    # Batched forward (f32, semantics-faithful) vs pure-JAX reference.
    log_probs = language_modeler_forward(ids, emb_table, w1, b1, w2, b2,
                                         block_b=128)
    log_probs = jax.block_until_ready(log_probs)
    ref = _ref_forward(ids, emb_table, w1, b1, w2, b2)

    assert log_probs.shape == (batch, vocab_size)
    assert jnp.allclose(log_probs, ref, atol=1e-4, rtol=1e-4)
    assert jnp.allclose(jnp.sum(jnp.exp(log_probs), axis=-1), 1.0, atol=1e-4)

    # Original single-context API: (C,) -> (1, V), same as the PyTorch module.
    single = language_modeler_forward(ids[0], emb_table, w1, b1, w2, b2)
    single = jax.block_until_ready(single)
    assert single.shape == (1, vocab_size)
    assert jnp.allclose(single, ref[0:1], atol=1e-4, rtol=1e-4)

    # bf16 matmul inputs (v6e/v7x MXU-native path), f32 accumulation/softmax.
    log_probs_bf16 = language_modeler_forward(
        ids, emb_table, w1, b1, w2, b2, block_b=128, compute_dtype=jnp.bfloat16
    )
    log_probs_bf16 = jax.block_until_ready(log_probs_bf16)
    assert log_probs_bf16.shape == (batch, vocab_size)
    assert jnp.allclose(jnp.sum(jnp.exp(log_probs_bf16), axis=-1), 1.0, atol=1e-3)

    print("KERNEL_OK")
</pallas_src>

<mosaic_0001>
module attributes {stable_mosaic.version = 11 : i64} {
  func.func @_lm_kernel(%arg0: i32, %arg1: memref<128x8xi32, #tpu.memory_space<vmem>>, %arg2: memref<8x128x128xf32, #tpu.memory_space<vmem>>, %arg3: memref<1x128xf32, #tpu.memory_space<vmem>>, %arg4: memref<128x128xf32, #tpu.memory_space<vmem>>, %arg5: memref<1x128xf32, #tpu.memory_space<vmem>>, %arg6: memref<128x128xf32, #tpu.memory_space<vmem>>) attributes {dimension_semantics = [#tpu.dimension_semantics<parallel>], iteration_bounds = array<i64: 2>, scalar_prefetch = 0 : i64, scratch_operands = 0 : i64, tpu.core_type = #tpu.core_type<tc>, window_params = [{transform_indices = @transform_0, window_bounds = array<i64: 128, 8>}, {pipeline_mode = #tpu.pipeline_mode<synchronous>, transform_indices = @transform_1, window_bounds = array<i64: 8, 128, 128>}, {pipeline_mode = #tpu.pipeline_mode<synchronous>, transform_indices = @transform_2, window_bounds = array<i64: 1, 128>}, {pipeline_mode = #tpu.pipeline_mode<synchronous>, transform_indices = @transform_3, window_bounds = array<i64: 128, 128>}, {pipeline_mode = #tpu.pipeline_mode<synchronous>, transform_indices = @transform_4, window_bounds = array<i64: 1, 128>}, {transform_indices = @transform_5, window_bounds = array<i64: 128, 128>}]} {
    %c0 = arith.constant 0 : index
    %c0_0 = arith.constant 0 : index
    %0 = vector.load %arg1[%c0, %c0_0] : memref<128x8xi32, #tpu.memory_space<vmem>>, vector<128x8xi32>
    %1 = tpu.iota {dimensions = array<i32: 1>} : vector<128x128xi32>
    %cst = arith.constant 0.000000e+00 : f32
    %2 = vector.broadcast %cst : f32 to vector<128x128xf32>
    %3 = vector.extract_strided_slice %0 {offsets = [0, 0], sizes = [128, 1], strides = [1, 1]} : vector<128x8xi32> to vector<128x1xi32>
    %4 = vector.broadcast %3 : vector<128x1xi32> to vector<128x128xi32>
    %5 = arith.cmpi eq, %4, %1 : vector<128x128xi32>
    %6 = arith.extui %5 : vector<128x128xi1> to vector<128x128xi32>
    %7 = arith.sitofp %6 : vector<128x128xi32> to vector<128x128xf32>
    %c0_1 = arith.constant 0 : index
    %c0_2 = arith.constant 0 : index
    %c0_3 = arith.constant 0 : index
    %8 = vector.load %arg2[%c0_1, %c0_2, %c0_3] : memref<8x128x128xf32, #tpu.memory_space<vmem>>, vector<1x128x128xf32>
    %9 = vector.shape_cast %8 : vector<1x128x128xf32> to vector<128x128xf32>
    %cst_4 = arith.constant dense<0.000000e+00> : vector<128x128xf32>
    %10 = tpu.matmul %7, %9, %cst_4 {dimension_numbers = #tpu.dot_dimension_numbers<[1], [0], [0], [1], [0, 0, 1, 1], [], []>} : vector<128x128xf32>, vector<128x128xf32>, vector<128x128xf32> -> vector<128x128xf32>
    %11 = arith.addf %2, %10 : vector<128x128xf32>
    %12 = vector.extract_strided_slice %0 {offsets = [0, 1], sizes = [128, 1], strides = [1, 1]} : vector<128x8xi32> to vector<128x1xi32>
    %13 = vector.broadcast %12 : vector<128x1xi32> to vector<128x128xi32>
    %14 = arith.cmpi eq, %13, %1 : vector<128x128xi32>
    %15 = arith.extui %14 : vector<128x128xi1> to vector<128x128xi32>
    %16 = arith.sitofp %15 : vector<128x128xi32> to vector<128x128xf32>
    %c1 = arith.constant 1 : index
    %c0_5 = arith.constant 0 : index
    %c0_6 = arith.constant 0 : index
    %17 = vector.load %arg2[%c1, %c0_5, %c0_6] : memref<8x128x128xf32, #tpu.memory_space<vmem>>, vector<1x128x128xf32>
    %18 = vector.shape_cast %17 : vector<1x128x128xf32> to vector<128x128xf32>
    %cst_7 = arith.constant dense<0.000000e+00> : vector<128x128xf32>
    %19 = tpu.matmul %16, %18, %cst_7 {dimension_numbers = #tpu.dot_dimension_numbers<[1], [0], [0], [1], [0, 0, 1, 1], [], []>} : vector<128x128xf32>, vector<128x128xf32>, vector<128x128xf32> -> vector<128x128xf32>
    %20 = arith.addf %11, %19 : vector<128x128xf32>
    %21 = vector.extract_strided_slice %0 {offsets = [0, 2], sizes = [128, 1], strides = [1, 1]} : vector<128x8xi32> to vector<128x1xi32>
    %22 = vector.broadcast %21 : vector<128x1xi32> to vector<128x128xi32>
    %23 = arith.cmpi eq, %22, %1 : vector<128x128xi32>
    %24 = arith.extui %23 : vector<128x128xi1> to vector<128x128xi32>
    %25 = arith.sitofp %24 : vector<128x128xi32> to vector<128x128xf32>
    %c2 = arith.constant 2 : index
    %c0_8 = arith.constant 0 : index
    %c0_9 = arith.constant 0 : index
    %26 = vector.load %arg2[%c2, %c0_8, %c0_9] : memref<8x128x128xf32, #tpu.memory_space<vmem>>, vector<1x128x128xf32>
    %27 = vector.shape_cast %26 : vector<1x128x128xf32> to vector<128x128xf32>
    %cst_10 = arith.constant dense<0.000000e+00> : vector<128x128xf32>
    %28 = tpu.matmul %25, %27, %cst_10 {dimension_numbers = #tpu.dot_dimension_numbers<[1], [0], [0], [1], [0, 0, 1, 1], [], []>} : vector<128x128xf32>, vector<128x128xf32>, vector<128x128xf32> -> vector<128x128xf32>
    %29 = arith.addf %20, %28 : vector<128x128xf32>
    %30 = vector.extract_strided_slice %0 {offsets = [0, 3], sizes = [128, 1], strides = [1, 1]} : vector<128x8xi32> to vector<128x1xi32>
    %31 = vector.broadcast %30 : vector<128x1xi32> to vector<128x128xi32>
    %32 = arith.cmpi eq, %31, %1 : vector<128x128xi32>
    %33 = arith.extui %32 : vector<128x128xi1> to vector<128x128xi32>
    %34 = arith.sitofp %33 : vector<128x128xi32> to vector<128x128xf32>
    %c3 = arith.constant 3 : index
    %c0_11 = arith.constant 0 : index
    %c0_12 = arith.constant 0 : index
    %35 = vector.load %arg2[%c3, %c0_11, %c0_12] : memref<8x128x128xf32, #tpu.memory_space<vmem>>, vector<1x128x128xf32>
    %36 = vector.shape_cast %35 : vector<1x128x128xf32> to vector<128x128xf32>
    %cst_13 = arith.constant dense<0.000000e+00> : vector<128x128xf32>
    %37 = tpu.matmul %34, %36, %cst_13 {dimension_numbers = #tpu.dot_dimension_numbers<[1], [0], [0], [1], [0, 0, 1, 1], [], []>} : vector<128x128xf32>, vector<128x128xf32>, vector<128x128xf32> -> vector<128x128xf32>
    %38 = arith.addf %29, %37 : vector<128x128xf32>
    %39 = vector.extract_strided_slice %0 {offsets = [0, 4], sizes = [128, 1], strides = [1, 1]} : vector<128x8xi32> to vector<128x1xi32>
    %40 = vector.broadcast %39 : vector<128x1xi32> to vector<128x128xi32>
    %41 = arith.cmpi eq, %40, %1 : vector<128x128xi32>
    %42 = arith.extui %41 : vector<128x128xi1> to vector<128x128xi32>
    %43 = arith.sitofp %42 : vector<128x128xi32> to vector<128x128xf32>
    %c4 = arith.constant 4 : index
    %c0_14 = arith.constant 0 : index
    %c0_15 = arith.constant 0 : index
    %44 = vector.load %arg2[%c4, %c0_14, %c0_15] : memref<8x128x128xf32, #tpu.memory_space<vmem>>, vector<1x128x128xf32>
    %45 = vector.shape_cast %44 : vector<1x128x128xf32> to vector<128x128xf32>
    %cst_16 = arith.constant dense<0.000000e+00> : vector<128x128xf32>
    %46 = tpu.matmul %43, %45, %cst_16 {dimension_numbers = #tpu.dot_dimension_numbers<[1], [0], [0], [1], [0, 0, 1, 1], [], []>} : vector<128x128xf32>, vector<128x128xf32>, vector<128x128xf32> -> vector<128x128xf32>
    %47 = arith.addf %38, %46 : vector<128x128xf32>
    %48 = vector.extract_strided_slice %0 {offsets = [0, 5], sizes = [128, 1], strides = [1, 1]} : vector<128x8xi32> to vector<128x1xi32>
    %49 = vector.broadcast %48 : vector<128x1xi32> to vector<128x128xi32>
    %50 = arith.cmpi eq, %49, %1 : vector<128x128xi32>
    %51 = arith.extui %50 : vector<128x128xi1> to vector<128x128xi32>
    %52 = arith.sitofp %51 : vector<128x128xi32> to vector<128x128xf32>
    %c5 = arith.constant 5 : index
    %c0_17 = arith.constant 0 : index
    %c0_18 = arith.constant 0 : index
    %53 = vector.load %arg2[%c5, %c0_17, %c0_18] : memref<8x128x128xf32, #tpu.memory_space<vmem>>, vector<1x128x128xf32>
    %54 = vector.shape_cast %53 : vector<1x128x128xf32> to vector<128x128xf32>
    %cst_19 = arith.constant dense<0.000000e+00> : vector<128x128xf32>
    %55 = tpu.matmul %52, %54, %cst_19 {dimension_numbers = #tpu.dot_dimension_numbers<[1], [0], [0], [1], [0, 0, 1, 1], [], []>} : vector<128x128xf32>, vector<128x128xf32>, vector<128x128xf32> -> vector<128x128xf32>
    %56 = arith.addf %47, %55 : vector<128x128xf32>
    %57 = vector.extract_strided_slice %0 {offsets = [0, 6], sizes = [128, 1], strides = [1, 1]} : vector<128x8xi32> to vector<128x1xi32>
    %58 = vector.broadcast %57 : vector<128x1xi32> to vector<128x128xi32>
    %59 = arith.cmpi eq, %58, %1 : vector<128x128xi32>
    %60 = arith.extui %59 : vector<128x128xi1> to vector<128x128xi32>
    %61 = arith.sitofp %60 : vector<128x128xi32> to vector<128x128xf32>
    %c6 = arith.constant 6 : index
    %c0_20 = arith.constant 0 : index
    %c0_21 = arith.constant 0 : index
    %62 = vector.load %arg2[%c6, %c0_20, %c0_21] : memref<8x128x128xf32, #tpu.memory_space<vmem>>, vector<1x128x128xf32>
    %63 = vector.shape_cast %62 : vector<1x128x128xf32> to vector<128x128xf32>
    %cst_22 = arith.constant dense<0.000000e+00> : vector<128x128xf32>
    %64 = tpu.matmul %61, %63, %cst_22 {dimension_numbers = #tpu.dot_dimension_numbers<[1], [0], [0], [1], [0, 0, 1, 1], [], []>} : vector<128x128xf32>, vector<128x128xf32>, vector<128x128xf32> -> vector<128x128xf32>
    %65 = arith.addf %56, %64 : vector<128x128xf32>
    %66 = vector.extract_strided_slice %0 {offsets = [0, 7], sizes = [128, 1], strides = [1, 1]} : vector<128x8xi32> to vector<128x1xi32>
    %67 = vector.broadcast %66 : vector<128x1xi32> to vector<128x128xi32>
    %68 = arith.cmpi eq, %67, %1 : vector<128x128xi32>
    %69 = arith.extui %68 : vector<128x128xi1> to vector<128x128xi32>
    %70 = arith.sitofp %69 : vector<128x128xi32> to vector<128x128xf32>
    %c7 = arith.constant 7 : index
    %c0_23 = arith.constant 0 : index
    %c0_24 = arith.constant 0 : index
    %71 = vector.load %arg2[%c7, %c0_23, %c0_24] : memref<8x128x128xf32, #tpu.memory_space<vmem>>, vector<1x128x128xf32>
    %72 = vector.shape_cast %71 : vector<1x128x128xf32> to vector<128x128xf32>
    %cst_25 = arith.constant dense<0.000000e+00> : vector<128x128xf32>
    %73 = tpu.matmul %70, %72, %cst_25 {dimension_numbers = #tpu.dot_dimension_numbers<[1], [0], [0], [1], [0, 0, 1, 1], [], []>} : vector<128x128xf32>, vector<128x128xf32>, vector<128x128xf32> -> vector<128x128xf32>
    %74 = arith.addf %65, %73 : vector<128x128xf32>
    %c0_26 = arith.constant 0 : index
    %c0_27 = arith.constant 0 : index
    %75 = vector.load %arg3[%c0_26, %c0_27] : memref<1x128xf32, #tpu.memory_space<vmem>>, vector<1x128xf32>
    %76 = vector.broadcast %75 : vector<1x128xf32> to vector<128x128xf32>
    %77 = arith.addf %74, %76 : vector<128x128xf32>
    %cst_28 = arith.constant 0.000000e+00 : f32
    %78 = vector.broadcast %cst_28 : f32 to vector<128x128xf32>
    %79 = arith.maximumf %77, %78 : vector<128x128xf32>
    %c0_29 = arith.constant 0 : index
    %c0_30 = arith.constant 0 : index
    %80 = vector.load %arg4[%c0_29, %c0_30] : memref<128x128xf32, #tpu.memory_space<vmem>>, vector<128x128xf32>
    %cst_31 = arith.constant dense<0.000000e+00> : vector<128x128xf32>
    %81 = tpu.matmul %79, %80, %cst_31 {dimension_numbers = #tpu.dot_dimension_numbers<[1], [0], [0], [1], [0, 0, 1, 1], [], []>} : vector<128x128xf32>, vector<128x128xf32>, vector<128x128xf32> -> vector<128x128xf32>
    %c0_32 = arith.constant 0 : index
    %c0_33 = arith.constant 0 : index
    %82 = vector.load %arg5[%c0_32, %c0_33] : memref<1x128xf32, #tpu.memory_space<vmem>>, vector<1x128xf32>
    %83 = vector.broadcast %82 : vector<1x128xf32> to vector<128x128xf32>
    %84 = arith.addf %81, %83 : vector<128x128xf32>
    %cst_34 = arith.constant dense<0xFF800000> : vector<128xf32>
    %85 = vector.multi_reduction <maximumf>, %84, %cst_34 [1] : vector<128x128xf32> to vector<128xf32>
    %86 = vector.shape_cast %85 : vector<128xf32> to vector<128x1xf32>
    %87 = vector.broadcast %86 : vector<128x1xf32> to vector<128x128xf32>
    %88 = arith.subf %84, %87 : vector<128x128xf32>
    %89 = math.exp %88 : vector<128x128xf32>
    %cst_35 = arith.constant dense<0.000000e+00> : vector<128xf32>
    %90 = vector.multi_reduction <add>, %89, %cst_35 [1] : vector<128x128xf32> to vector<128xf32>
    %91 = vector.shape_cast %90 : vector<128xf32> to vector<128x1xf32>
    %92 = math.log %91 : vector<128x1xf32>
    %93 = vector.broadcast %92 : vector<128x1xf32> to vector<128x128xf32>
    %94 = arith.subf %88, %93 : vector<128x128xf32>
    %c0_36 = arith.constant 0 : index
    %c0_37 = arith.constant 0 : index
    %95 = vector.load %arg6[%c0_36, %c0_37] : memref<128x128xf32, #tpu.memory_space<vmem>>, vector<128x128xf32>
    tpu.vector_store %arg6[%c0_36, %c0_37], %94 {strides = array<i32>} : memref<128x128xf32, #tpu.memory_space<vmem>>, vector<128x128xf32>,
    return
  }
  func.func @transform_0(%arg0: i32) -> (i32, i32) {
    %c0_i32 = arith.constant 0 : i32
    %c0_i32_0 = arith.constant 0 : i32
    return %arg0, %c0_i32 : i32, i32
  }
  func.func @transform_1(%arg0: i32) -> (i32, i32, i32) {
    %c0_i32 = arith.constant 0 : i32
    %c0_i32_0 = arith.constant 0 : i32
    %c0_i32_1 = arith.constant 0 : i32
    %c0_i32_2 = arith.constant 0 : i32
    return %c0_i32, %c0_i32_0, %c0_i32_1 : i32, i32, i32
  }
  func.func @transform_2(%arg0: i32) -> (i32, i32) {
    %c0_i32 = arith.constant 0 : i32
    %c0_i32_0 = arith.constant 0 : i32
    %c0_i32_1 = arith.constant 0 : i32
    return %c0_i32, %c0_i32_0 : i32, i32
  }
  func.func @transform_3(%arg0: i32) -> (i32, i32) {
    %c0_i32 = arith.constant 0 : i32
    %c0_i32_0 = arith.constant 0 : i32
    %c0_i32_1 = arith.constant 0 : i32
    return %c0_i32, %c0_i32_0 : i32, i32
  }
  func.func @transform_4(%arg0: i32) -> (i32, i32) {
    %c0_i32 = arith.constant 0 : i32
    %c0_i32_0 = arith.constant 0 : i32
    %c0_i32_1 = arith.constant 0 : i32
    return %c0_i32, %c0_i32_0 : i32, i32
  }
  func.func @transform_5(%arg0: i32) -> (i32, i32) {
    %c0_i32 = arith.constant 0 : i32
    %c0_i32_0 = arith.constant 0 : i32
    return %arg0, %c0_i32 : i32, i32
  }
}

</mosaic_0001>

<bundles_post_ra>
// kernel: tpu_custom_call.1
= control target key start
LH: loop header
LB: loop body
LE: loop exit
PB: predicated region body
PF: predicated region fallthrough
CT: control target
= control target key end

     0   :  { %10 = vsyncpa [#allocation3], 0  ;;  %s4000_s0 = inlined_call_operand.vmem [shape: s32[256,8], index: 0, kind: input, shape index: {}]   ;;  %s4001_s1 = inlined_call_operand.hbm [shape: f32[8,128,128], index: 1, kind: input, shape index: {}]   ;;  %s4002_s2 = inlined_call_operand.vmem [shape: f32[1,128], index: 2, kind: input, shape index: {}]   ;;  %s4003_s3 = inlined_call_operand.vmem [shape: f32[128,128], index: 3, kind: input, shape index: {}]   ;;  %s4004_s4 = inlined_call_operand.vmem [shape: f32[1,128], index: 4, kind: input, shape index: {}]   ;;  %s4005_s5 = inlined_call_operand.hbm [shape: f32[256,128], index: 5, kind: output, shape index: {}]  }
   0x1   :  { %11 = vsyncpa [#allocation4], 0 }
   0x2   :  { %13 = vsyncpa [#allocation4 + $0x1], 0  ;;  %s2856_s18 = smov 0   ;;  %s2858_s19 = smov 0  }
   0x3   :  { %s2860_s20 = smov 0   ;;  %s2862_s21 = smov 0  }
   0x4 LB: > { %s2877_s22 = sadd.s32 4294967295, %s2810_s21   ;;  %s2167_s23 = sadd.s32 4294967294, %s2810_s21   ;;  %s2810_s21 = sphi %s2862_s21, %s4011_s21   ;;  %s2806_s20 = sphi %s2860_s20, %s4010_s20   ;;  %s2802_s19 = sphi %s2858_s19, %s4009_s19   ;;  %s2798_s18 = sphi %s2856_s18, %s4008_s18  }
   0x5   : > { %s2881_s24 = sadd.s32 1, %s2810_s21   ;;  %s136_s25 = sadd.s32 1, %s2806_s20 }
   0x6   : > { %s133_s26 = ssub.s32 %s2810_s21, %s2881_s24  ;;  %p146_p0 = scmp.ne.s32.totalorder %s2806_s20, %s2802_s19 }
   0x7   : > { %p134_p1 = scmp.eq.s32.totalorder %s133_s26, 0  ;;  %p147_p2 = scmp.eq.s32.totalorder %s2877_s22, 1 }
   0x8   : > { %p152_p3 = scmp.ne.s32.totalorder %s2802_s19, %s2798_s18  ;;  %p153_p4 = scmp.eq.s32.totalorder %s2167_s23, 1 }
   0x9   : > { %s2892_s27 = scalar_select %p134_p1, %s2806_s20, %s136_s25  }
   0xa   : > { %p2894_p5 = por %p147_p2, %p146_p0  ;;  %p2898_p6 = por %p153_p4, %p152_p3 }
   0xb   : > { %p2168_p7 = scmp.ge.s32.totalorder %s2810_s21, 1  ;;  %p160_p8 = scmp.lt.s32.totalorder %s2810_s21, 3 }
   0xc   : > { %p2500_p9 = scmp.eq.s32.totalorder %s2877_s22, 0  ;;  %s171_s7 = sshll.u32 %s4001_s1, 4  ;;  %s172_s7 = int_to_ptr.hbm [resolvable:$true] %s171_s7 }
   0xd   : > { %p161_p10 = pnand %p2168_p7, %p160_p8  ;;  %s2812_s8 = smov [#allocation2]  }
   0xe   : > { %s173_s9 = sshll.u32 %s2812_s8, 4  ;;  %s2813_s10 = smov 128   ;;  %s174_s9 = int_to_ptr.vmem [resolvable:$true] %s173_s9 }
   0xf   : > { %p2492_p11 = pneg %p161_p10  ;;  %s2814_s11 = smov 8  }
  0x10   : > { %207 = sbr.rel (%p161_p10) target bundleno = 1089 (0x441), region = 40 }
  0x11   : > { %p2493_p12 = pnand %p2500_p9, %p2492_p11 }
  0x13   : > { %2495 = dma.hbm_to_vmem [thread:$0]  (!%p2493_p12), %s172_s7, 16384, %s174_s9, [#allocation3], %s2813_s10, %s2813_s10, %s2814_s11  }
  0x15   : > { %2789 = dma.done.wait (%p2500_p9), [#allocation3], 16384  }
  0x16   : > { %2791 = vsyncadd (%p2500_p9), [#allocation3], 4294950912  ;;  %s2174_s12 = sshll.u32 %s2877_s22, 4  ;;  %v2815_v0 = vmov 0   ;;  %v2816_v17 = vmov 1   ;;  %v2817_v18 = vmov 2   ;;  %v259_v48 = vlaneseq }
  0x17   : > { %2551 = vset.pattern.permute.xlu2 %v2815_v0  ;;  %2550 = vset.pattern.permute.xlu1 %v2815_v0  ;;  %p237_p13 = scmp.lt.s32.totalorder %s2174_s12, 31  ;;  %v2818_v20 = vmov 3   ;;  %v485_v21 = vld [vmem:[#allocation2 + $0xf8] sm:$0xff]  ;;  %v484_v22 = vld [vmem:[#allocation2 + $0xf0] sm:$0xff]  ;;  %v483_v23 = vld [vmem:[#allocation2 + $0xe8] sm:$0xff]  ;;  %v2819_v57 = vmov 1.0  }
  0x18   : > { %2549 = vset.pattern.permute.xlu0 %v2815_v0  ;;  %486 = vmatpush.msra.mxu0 %v485_v21  ;;  %v482_v25 = vld [vmem:[#allocation2 + $0xe0] sm:$0xff]  ;;  %v481_v26 = vld [vmem:[#allocation2 + $0xd8] sm:$0xff]  ;;  %v480_v27 = vld [vmem:[#allocation2 + $0xd0] sm:$0xff]  ;;  %v3088_v52 = vand.u32 127, %v259_v48  ;;  %s233_s30 = sand.u32 1, %s2802_s19   ;;  %s2437_s8 = sshll.u32 %s2877_s22, 7 }
  0x19   : > { %s4013_s12 = smov (!%p237_p13, %s2174_s12), 31  ;;  %2438 = vmatpush.msra.mxu1 %v485_v21  ;;  %2440 = vmatpush.msra.mxu3 %v485_v21  ;;  %v3015_v28 = vld [vmem:[#allocation2 + $0xc8] sm:$0xff]  ;;  %v478_v30 = vld [vmem:[#allocation2 + $0xc0] sm:$0xff]  ;;  %v477_v31 = vld [vmem:[#allocation2 + $0xb8] sm:$0xff]  ;;  %s2173_s6 = sshll.u32 %s233_s30, 7 }
  0x1a   : > { %s2175_s13 = sshll.u32 %s4013_s12, 3  ;;  %2439 = vmatpush.msra.mxu2 %v485_v21  ;;  %487 = vmatpush.msra.mxu0 %v484_v22  ;;  %v3026_v32 = vld [vmem:[#allocation2 + $0xb0] sm:$0xff]  ;;  %v3029_v33 = vld [vmem:[#allocation2 + $0xa8] sm:$0xff]  ;;  %v474_v37 = vld [vmem:[#allocation2 + $0xa0] sm:$0xff]  ;;  %s3929_s7 = scalar_lea.vmem [#allocation5], %s2173_s6 }
  0x1b   : > { %s2918_s16 = scalar_lea.vmem %s4000_s0, %s2175_s13  ;;  %2441 = vmatpush.msra.mxu1 %v484_v22  ;;  %2443 = vmatpush.msra.mxu3 %v484_v22  ;;  %v3044_v38 = vld [vmem:[#allocation2 + $0x98] sm:$0xff]  ;;  %v3049_v39 = vld [vmem:[#allocation2 + $0x90] sm:$0xff]  ;;  %v3053_v40 = vld [vmem:[#allocation2 + $0x88] sm:$0xff]  ;;  %s2089_s11 = scalar_lea.hbm %s4005_s5, %s2437_s8 }
  0x1c   : > { %v2921_v1 = vld [vmem:[%s2918_s16 + $0x20] sm:$0xff]  ;;  %v2924_v2 = vld [vmem:[%s2918_s16 + $0x10] sm:$0xff]  ;;  %v2933_v4 = vld [vmem:[%s2918_s16 + $0x28] sm:$0xff]  ;;  %488 = vmatpush.msra.mxu0 %v483_v23  ;;  %2442 = vmatpush.msra.mxu2 %v484_v22  ;;  %s2090_s12 = sshll.u32 %s3929_s7, 4  ;;  %s2092_s13 = sshll.u32 %s2089_s11, 4  ;;  %s2091_s12 = int_to_ptr.vmem [resolvable:$true] %s2090_s12  ;;  %s2093_s13 = int_to_ptr.hbm [resolvable:$true] %s2092_s13 }
  0x1d   : > { %v2927_v3 = vld [vmem:[%s2918_s16] sm:$0xff]  ;;  %274 = vperm.xlu2 %2551, %v2921_v1   ;;  %268 = vperm.xlu1 %2550, %v2924_v2   ;;  %v2936_v5 = vld [vmem:[%s2918_s16 + $0x18] sm:$0xff]  ;;  %v2939_v6 = vld [vmem:[%s2918_s16 + $0x8] sm:$0xff]  ;;  %s2078_s14 = scalar_lea.sflag [#allocation4], %s233_s30  ;;  %s2758_s15 = sshra.s32 %s2093_s13, 4  ;;  %s2759_s15 = int_to_ptr.hbm [resolvable:$true] %s2758_s15 }
  0x1e   : > { %262 = vperm.xlu0 %2549, %v2927_v3   ;;  %v2945_v7 = vld [vmem:[%s2918_s16 + $0x40] sm:$0xff]  ;;  %v2948_v8 = vld [vmem:[%s2918_s16 + $0x38] sm:$0xff]  ;;  %v2951_v9 = vld [vmem:[%s2918_s16 + $0x30] sm:$0xff]  ;;  %2444 = vmatpush.msra.mxu1 %v483_v23  ;;  %s2760_s22 = scalar_lea.hbm %s2759_s15, 128  ;;  %s2764_s23 = scalar_lea.hbm %s4005_s5, 256 }
  0x1f   : > { %v2957_v10 = vld [vmem:[%s2918_s16 + $0x58] sm:$0xff]  ;;  %v2960_v11 = vld [vmem:[%s2918_s16 + $0x50] sm:$0xff]  ;;  %v2963_v12 = vld [vmem:[%s2918_s16 + $0x48] sm:$0xff]  ;;  %489 = vmatpush.msra.mxu0 %v482_v25  ;;  %2446 = vmatpush.msra.mxu3 %v483_v23  ;;  %p2761_p0 = scmp.ne.s32.totalorder %s2759_s15, %s2760_s22  ;;  %p2765_p3 = scmp.lt.s32.totalorder %s2759_s15, %s4005_s5 }
  0x20   : > { %v2969_v13 = vld [vmem:[%s2918_s16 + $0x70] sm:$0xff]  ;;  %v2972_v14 = vld [vmem:[%s2918_s16 + $0x68] sm:$0xff]  ;;  %v2975_v15 = vld [vmem:[%s2918_s16 + $0x60] sm:$0xff]  ;;  %2447 = vmatpush.msra.mxu1 %v482_v25  ;;  %2445 = vmatpush.msra.mxu2 %v483_v23  ;;  %p2766_p4 = scmp.lt.s32.totalorder %s2764_s23, %s2760_s22 }
  0x21   : > { %v2981_v16 = vld [vmem:[%s2918_s16 + $0x78] sm:$0xff]  ;;  %490 = vmatpush.msra.mxu0 %v481_v26  ;;  %2449 = vmatpush.msra.mxu3 %v482_v25  ;;  %v470_v44 = vld [vmem:[#allocation2 + $0x80] sm:$0xff]  ;;  %v371_v50 = vld [vmem:[#allocation2 + $0x70] sm:$0xff]  ;;  %p2762_p1 = pnand %p2761_p0, %p2894_p5 }
  0x22   : > { %2450 = vmatpush.msra.mxu1 %v481_v26  ;;  %2448 = vmatpush.msra.mxu2 %v482_v25  ;;  %v372_v49 = vld [vmem:[#allocation2 + $0x78] sm:$0xff]  ;;  %v370_v51 = vld [vmem:[#allocation2 + $0x68] sm:$0xff]  ;;  %v369_v56 = vld [vmem:[#allocation2 + $0x60] sm:$0xff]  ;;  %p2767_p7 = por %p2766_p4, %p2765_p3 }
  0x23   : > { %491 = vmatpush.msra.mxu0 %v480_v27  ;;  %2452 = vmatpush.msra.mxu3 %v481_v26  ;;  %v368_v58 = vld [vmem:[#allocation2 + $0x58] sm:$0xff]  ;;  %v367_v59 = vld [vmem:[#allocation2 + $0x50] sm:$0xff]  ;;  %v366_v61 = vld [vmem:[#allocation2 + $0x48] sm:$0xff]  ;;  %p2763_p2 = pneg %p2762_p1 }
  0x24   : > { %2453 = vmatpush.msra.mxu1 %v480_v27  ;;  %2451 = vmatpush.msra.mxu2 %v481_v26  ;;  %v365_v0 = vld [vmem:[#allocation2 + $0x40] sm:$0xff]  ;;  %v728_v21 = vld [vmem:[#allocation2 + $0x178] sm:$0xff]  ;;  %v363_v22 = vld [vmem:[#allocation2 + $0x30] sm:$0xff]  ;;  %v2820_v26 = vmov 7  }
  0x25   : > { %277 = vperm.xlu2 %2551, %v2933_v4   ;;  %271 = vperm.xlu1 %2550, %v2936_v5   ;;  %v727_v23 = vld [vmem:[#allocation2 + $0x170] sm:$0xff]  ;;  %v922_v25 = vld [vmem:[#allocation2 + $0x1f8] sm:$0xff]  ;;  %p2768_p8 = pnand %p2767_p7, %p2763_p2 }
  0x26   : > { %265 = vperm.xlu0 %2549, %v2939_v6   ;;  %492 = vmatpush.msra.mxu0 %v3015_v28  ;;  %v359_v48 = vld [vmem:[#allocation2 + $0x10] sm:$0xff] }
  0x27   : > { %2456 = vmatpush.msra.mxu1 %v3015_v28  ;;  %2455 = vmatpush.msra.mxu3 %v480_v27 }
  0x28   : > { %493 = vmatpush.msra.mxu0 %v478_v30  ;;  %2454 = vmatpush.msra.mxu2 %v480_v27  ;;  %v362_v27 = vld [vmem:[#allocation2 + $0x28] sm:$0xff] }
  0x29   : > { %2459 = vmatpush.msra.mxu1 %v478_v30  ;;  %2458 = vmatpush.msra.mxu3 %v3015_v28 }
  0x2a   : > { %494 = vmatpush.msra.mxu0 %v477_v31  ;;  %2457 = vmatpush.msra.mxu2 %v3015_v28  ;;  %v726_v28 = vld [vmem:[#allocation2 + $0x168] sm:$0xff] }
  0x2b   : > { %2462 = vmatpush.msra.mxu1 %v477_v31  ;;  %2461 = vmatpush.msra.mxu3 %v478_v30 }
  0x2c   : > { %495 = vmatpush.msra.mxu0 %v3026_v32  ;;  %2460 = vmatpush.msra.mxu2 %v478_v30  ;;  %v921_v30 = vld [vmem:[#allocation2 + $0x1f0] sm:$0xff] }
  0x2d   : > { %286 = vperm.xlu2 %2551, %v2945_v7   ;;  %283 = vperm.xlu1 %2550, %v2948_v8  }
  0x2e   : > { %280 = vperm.xlu0 %2549, %v2951_v9   ;;  %2465 = vmatpush.msra.mxu1 %v3026_v32 }
  0x2f   : > { %496 = vmatpush.msra.mxu0 %v3029_v33  ;;  %2464 = vmatpush.msra.mxu3 %v477_v31 }
  0x30   : > { %2468 = vmatpush.msra.mxu1 %v3029_v33  ;;  %2463 = vmatpush.msra.mxu2 %v477_v31 }
  0x31   : > { %497 = vmatpush.msra.mxu0 %v474_v37  ;;  %2467 = vmatpush.msra.mxu3 %v3026_v32 }
  0x32   : > { %2471 = vmatpush.msra.mxu1 %v474_v37  ;;  %2466 = vmatpush.msra.mxu2 %v3026_v32 }
  0x33   : > { %498 = vmatpush.msra.mxu0 %v3044_v38  ;;  %2470 = vmatpush.msra.mxu3 %v3029_v33 }
  0x34   : > { %2474 = vmatpush.msra.mxu1 %v3044_v38  ;;  %2469 = vmatpush.msra.mxu2 %v3029_v33  ;;  %v361_v33 = vld [vmem:[#allocation2 + $0x20] sm:$0xff] }
  0x35   : > { %295 = vperm.xlu2 %2551, %v2957_v10   ;;  %292 = vperm.xlu1 %2550, %v2960_v11  }
  0x36   : > { %289 = vperm.xlu0 %2549, %v2963_v12   ;;  %499 = vmatpush.msra.mxu0 %v3049_v39 }
  0x37   : > { %2477 = vmatpush.msra.mxu1 %v3049_v39  ;;  %2473 = vmatpush.msra.mxu3 %v474_v37 }
  0x38   : > { %500 = vmatpush.msra.mxu0 %v3053_v40  ;;  %2472 = vmatpush.msra.mxu2 %v474_v37  ;;  %v725_v37 = vld [vmem:[#allocation2 + $0x160] sm:$0xff] }
  0x39   : > { %2480 = vmatpush.msra.mxu1 %v3053_v40  ;;  %2476 = vmatpush.msra.mxu3 %v3044_v38 }
  0x3a   : > { %501 = vmatpush.msra.mxu0 %v470_v44  ;;  %2475 = vmatpush.msra.mxu2 %v3044_v38  ;;  %v920_v38 = vld [vmem:[#allocation2 + $0x1e8] sm:$0xff] }
  0x3b   : > { %2483 = vmatpush.msra.mxu1 %v470_v44  ;;  %2479 = vmatpush.msra.mxu3 %v3049_v39 }
  0x3c   : > { %2478 = vmatpush.msra.mxu2 %v3049_v39  ;;  %v360_v39 = vld [vmem:[#allocation2 + $0x18] sm:$0xff] }
  0x3d   : > { %304 = vperm.xlu2 %2551, %v2969_v13   ;;  %301 = vperm.xlu1 %2550, %v2972_v14  }
  0x3e   : > { %298 = vperm.xlu0 %2549, %v2975_v15   ;;  %2482 = vmatpush.msra.mxu3 %v3053_v40 }
  0x3f   : > { %551 = vmatpush.msrb.mxu1 %v372_v49  ;;  %2481 = vmatpush.msra.mxu2 %v3053_v40  ;;  %v724_v40 = vld [vmem:[#allocation2 + $0x158] sm:$0xff]  ;;  %v723_v49 = vld [vmem:[#allocation2 + $0x150] sm:$0xff] }
  0x40   : > { %2485 = vmatpush.msra.mxu3 %v470_v44 }
  0x41   : > { %552 = vmatpush.msrb.mxu1 %v371_v50  ;;  %2484 = vmatpush.msra.mxu2 %v470_v44  ;;  %v919_v44 = vld [vmem:[#allocation2 + $0x1e0] sm:$0xff] }
  0x42   : > { %923 = vmatpush.msrb.mxu3 %v922_v25 }
  0x43   : > { %553 = vmatpush.msrb.mxu1 %v370_v51  ;;  %729 = vmatpush.msrb.mxu2 %v728_v21  ;;  %v918_v51 = vld [vmem:[#allocation2 + $0x1d8] sm:$0xff]  ;;  %v721_v21 = vld [vmem:[#allocation2 + $0x140] sm:$0xff] }
  0x44   : > { %924 = vmatpush.msrb.mxu3 %v921_v30 }
  0x45   : > { %2553 = vset.pattern.permute.xlu2 %v2816_v17  ;;  %2552 = vset.pattern.permute.xlu1 %v2816_v17 }
  0x46   : > { %307 = vperm.xlu0 %2549, %v2981_v16   ;;  %377 = vperm.xlu2 %2553, %v2939_v6  }
  0x47   : > { %374 = vperm.xlu1 %2552, %v2927_v3   ;;  %554 = vmatpush.msrb.mxu1 %v369_v56 }
  0x48   : > { %730 = vmatpush.msrb.mxu2 %v727_v23  ;;  %925 = vmatpush.msrb.mxu3 %v920_v38  ;;  %v915_v23 = vld [vmem:[#allocation2 + $0x1c0] sm:$0xff]  ;;  %v913_v38 = vld [vmem:[#allocation2 + $0x1b0] sm:$0xff] }
  0x49   : > { %555 = vmatpush.msrb.mxu1 %v368_v58 }
  0x4a   : > { %731 = vmatpush.msrb.mxu2 %v726_v28  ;;  %926 = vmatpush.msrb.mxu3 %v919_v44  ;;  %v719_v28 = vld [vmem:[#allocation2 + $0x130] sm:$0xff]  ;;  %v716_v44 = vld [vmem:[#allocation2 + $0x118] sm:$0xff] }
  0x4b   : > { %556 = vmatpush.msrb.mxu1 %v367_v59  ;;  %v358_v59 = vld [vmem:[#allocation2 + $0x8] sm:$0xff] }
  0x4c   : > { %732 = vmatpush.msrb.mxu2 %v725_v37  ;;  %927 = vmatpush.msrb.mxu3 %v918_v51  ;;  %v718_v37 = vld [vmem:[#allocation2 + $0x128] sm:$0xff]  ;;  %v910_v51 = vld [vmem:[#allocation2 + $0x198] sm:$0xff] }
  0x4d   : > { %557 = vmatpush.msrb.mxu1 %v366_v61  ;;  %v722_v61 = vld [vmem:[#allocation2 + $0x148] sm:$0xff] }
  0x4e   : > { %2554 = vset.pattern.permute.xlu0 %v2816_v17  ;;  %386 = vperm.xlu2 %2553, %v2921_v1   ;;  %v364_v17 = vld [vmem:[#allocation2 + $0x38] sm:$0xff] }
  0x4f   : > { %383 = vperm.xlu1 %2552, %v2936_v5   ;;  %380 = vperm.xlu0 %2554, %v2924_v2  }
  0x50   : > { %558 = vmatpush.msrb.mxu1 %v365_v0  ;;  %733 = vmatpush.msrb.mxu2 %v724_v40  ;;  %v917_v0 = vld [vmem:[#allocation2 + $0x1d0] sm:$0xff]  ;;  %v912_v40 = vld [vmem:[#allocation2 + $0x1a8] sm:$0xff] }
  0x51   : > { %928 = vmatpush.msrb.mxu3 %v917_v0 }
  0x52   : > { %559 = vmatpush.msrb.mxu1 %v364_v17  ;;  %734 = vmatpush.msrb.mxu2 %v723_v49  ;;  %v357_v17 = vld [vmem:[#allocation2] sm:$0xff] }
  0x54   : > { %560 = vmatpush.msrb.mxu1 %v363_v22  ;;  %v916_v22 = vld [vmem:[#allocation2 + $0x1c8] sm:$0xff]  ;;  %735 = vmatpush.msrb.mxu2 %v722_v61 }
  0x55   : > { %929 = vmatpush.msrb.mxu3 %v916_v22 }
  0x56   : > { %392 = vperm.xlu2 %2553, %v2951_v9   ;;  %561 = vmatpush.msrb.mxu1 %v362_v27 }
  0x57   : > { %389 = vperm.xlu1 %2552, %v2933_v4   ;;  %395 = vperm.xlu0 %2554, %v2948_v8  }
  0x58   : > { %562 = vmatpush.msrb.mxu1 %v361_v33  ;;  %736 = vmatpush.msrb.mxu2 %v721_v21  ;;  %v2822_v33 = vmov 6  }
  0x59   : > { %930 = vmatpush.msrb.mxu3 %v915_v23  ;;  %v1116_v23 = vld [vmem:[#allocation2 + $0x278] sm:$0xff] }
  0x5a   : > { %563 = vmatpush.msrb.mxu1 %v360_v39  ;;  %v717_v39 = vld [vmem:[#allocation2 + $0x120] sm:$0xff]  ;;  %1117 = vmatpush.msrb.mxu0 %v1116_v23  ;;  %v1300_v23 = vld [vmem:[#allocation2 + $0x2a8] sm:$0xff] }
  0x5c   : > { %564 = vmatpush.msrb.mxu1 %v359_v48 }
  0x5e   : > { %401 = vperm.xlu2 %2553, %v2963_v12   ;;  %565 = vmatpush.msrb.mxu1 %v358_v59  ;;  %v908_v59 = vld [vmem:[#allocation2 + $0x188] sm:$0xff] }
  0x5f   : > { %398 = vperm.xlu1 %2552, %v2945_v7   ;;  %404 = vperm.xlu0 %2554, %v2960_v11  }
  0x60   : > { %566 = vmatpush.msrb.mxu1 %v357_v17  ;;  %v907_v17 = vld [vmem:[#allocation2 + $0x180] sm:$0xff] }
  0x66   : > { %410 = vperm.xlu2 %2553, %v2975_v15  }
  0x67   : > { %407 = vperm.xlu1 %2552, %v2957_v10   ;;  %413 = vperm.xlu0 %2554, %v2972_v14  }
  0x6e   : > { %419 = vperm.xlu2 %2553, %v2981_v16  }
  0x6f   : > { %416 = vperm.xlu1 %2552, %v2969_v13   ;;  %2555 = vset.pattern.permute.xlu0 %v2817_v18 }
  0x70   : > { %617 = vperm.xlu0 %2555, %v2927_v3  }
  0x76   : > { %2557 = vset.pattern.permute.xlu2 %v2817_v18 }
  0x77   : > { %2556 = vset.pattern.permute.xlu1 %v2817_v18  ;;  %v3004_v19 = vpop.permute.xlu2 %274  ;;  %623 = vperm.xlu2 %2557, %v2924_v2  }
  0x78   : > { %620 = vperm.xlu1 %2556, %v2939_v6   ;;  %2558 = vset.pattern.permute.xlu0 %v2818_v20 }
  0x79   : > { %811 = vperm.xlu0 %2558, %v2927_v3  }
  0x7f   : > { %v3010_v24 = vpop.permute.xlu2 %277  ;;  %629 = vperm.xlu2 %2557, %v2921_v1  }
  0x80   : > { %626 = vperm.xlu1 %2556, %v2936_v5  }
  0x81   : > { %823 = vperm.xlu0 %2558, %v2921_v1  }
  0x87   : > { %v3017_v29 = vpop.permute.xlu2 %286  ;;  %2560 = vset.pattern.permute.xlu2 %v2818_v20 }
  0x88   : > { %2559 = vset.pattern.permute.xlu1 %v2818_v20  ;;  %817 = vperm.xlu2 %2560, %v2924_v2  }
  0x89   : > { %814 = vperm.xlu1 %2559, %v2939_v6   ;;  %829 = vperm.xlu0 %2558, %v2951_v9  }
  0x8f   : > { %v3031_v34 = vpop.permute.xlu2 %295  ;;  %v3033_v35 = vpop.permute.xlu1 %268 }
  0x90   : > { %820 = vperm.xlu2 %2560, %v2936_v5   ;;  %v3037_v36 = vpop.permute.xlu0 %262 }
  0x91   : > { %2561 = vset.pattern.permute.xlu1 %v2817_v18  ;;  %2566 = vset.pattern.permute.xlu0 %v2817_v18  ;;  %vm309_vm13 = vcmp.eq.s32.totalorder %v3037_v36, %v3088_v52 }
  0x92   : > { %632 = vperm.xlu1 %2561, %v2933_v4   ;;  %641 = vperm.xlu0 %2566, %v2945_v7  }
  0x97   : > { %v3055_v41 = vpop.permute.xlu2 %304  ;;  %v3057_v42 = vpop.permute.xlu1 %271 }
  0x98   : > { %2563 = vset.pattern.permute.xlu2 %v2817_v18  ;;  %v3061_v43 = vpop.permute.xlu0 %265 }
  0x99   : > { %635 = vperm.xlu2 %2563, %v2951_v9   ;;  %vm310_vm15 = vcmp.eq.s32.totalorder %v3061_v43, %v3088_v52 }
  0x9a   : > { %2562 = vset.pattern.permute.xlu1 %v2818_v20  ;;  %656 = vperm.xlu0 %2566, %v2972_v14  }
  0x9b   : > { %826 = vperm.xlu1 %2562, %v2933_v4  }
  0x9f   : > { %v3073_v45 = vpop.permute.xlu1 %283 }
  0xa0   : > { %v3076_v46 = vpop.permute.xlu2 %377  ;;  %v3078_v47 = vpop.permute.xlu0 %280 }
  0xa1   : > { %2565 = vset.pattern.permute.xlu2 %v2818_v20  ;;  %vm422_vm3 = vcmp.eq.s32.totalorder %v3076_v46, %v3088_v52  ;;  %v720_v46 = vld [vmem:[#allocation2 + $0x138] sm:$0xff] }
  0xa2   : > { %832 = vperm.xlu2 %2565, %v2948_v8   ;;  %2571 = vset.pattern.permute.xlu0 %v2818_v20 }
  0xa3   : > { %2564 = vset.pattern.permute.xlu1 %v2817_v18  ;;  %841 = vperm.xlu0 %2571, %v2960_v11  }
  0xa4   : > { %638 = vperm.xlu1 %2564, %v2948_v8   ;;  %737 = vmatpush.msrb.mxu2 %v720_v46 }
  0xa6   : > { %738 = vmatpush.msrb.mxu2 %v719_v28 }
  0xa7   : > { %v3090_v53 = vpop.permute.xlu1 %292 }
  0xa8   : > { %v387_v54 = vpop.permute.xlu2 %386  ;;  %v3093_v55 = vpop.permute.xlu0 %289  ;;  %739 = vmatpush.msrb.mxu2 %v718_v37 }
  0xa9   : > { %vm425_vm0 = vcmp.eq.s32.totalorder %v387_v54, %v3088_v52  ;;  %v2821_v54 = vmov 5  }
  0xaa   : > { %2568 = vset.pattern.permute.xlu2 %v2817_v18  ;;  %2212 = vmatmul.msk.f32.vlgmr.msra.gmra.mxu1 %vm425_vm0, %v2819_v57 }
  0xab   : > { %644 = vperm.xlu2 %2568, %v2963_v12   ;;  %856 = vperm.xlu0 %2571, %v2981_v16  }
  0xac   : > { %2567 = vset.pattern.permute.xlu1 %v2818_v20  ;;  %740 = vmatpush.msrb.mxu2 %v717_v39  ;;  %v1107_v39 = vld [vmem:[#allocation2 + $0x230] sm:$0xff] }
  0xad   : > { %835 = vperm.xlu1 %2567, %v2945_v7  }
  0xae   : > { %741 = vmatpush.msrb.mxu2 %v716_v44  ;;  %v1105_v44 = vld [vmem:[#allocation2 + $0x220] sm:$0xff] }
  0xaf   : > { %v3104_v60 = vpop.permute.xlu1 %301 }
  0xb0   : > { %v3106_v62 = vpop.permute.xlu2 %392  ;;  %v3108_v63 = vpop.permute.xlu0 %298 }
  0xb1   : > { %vm427_vm7 = vcmp.eq.s32.totalorder %v3106_v62, %v3088_v52  ;;  %v713_v62 = vld [vmem:[#allocation2 + $0x100] sm:$0xff] }
  0xb3   : > { %647 = vperm.xlu2 %2568, %v2960_v11   ;;  %2586 = vset.pattern.permute.xlu0 %v2820_v26 }
  0xb4   : > { %1596 = vperm.xlu0 %2586, %v2936_v5  }
  0xb5   : > { %838 = vperm.xlu1 %2567, %v2963_v12  }
  0xb8   : > { %v3114_v31 = vpop.permute.xlu2 %401  ;;  %v3116_v11 = vpop.permute.xlu0 %307 }
  0xb9   : > { %v375_v32 = vpop.permute.xlu1 %374  ;;  %vm430_vm11 = vcmp.eq.s32.totalorder %v3114_v31, %v3088_v52 }
  0xba   : > { %vm421_vm1 = vcmp.eq.s32.totalorder %v375_v32, %v3088_v52  ;;  %v914_v32 = vld [vmem:[#allocation2 + $0x1b8] sm:$0xff] }
  0xbb   : > { %2208 = vmatmul.msk.f32.vlgmr.msra.gmra.mxu0 %vm421_vm1, %v2819_v57  ;;  %2570 = vset.pattern.permute.xlu2 %v2818_v20 }
  0xbc   : > { %844 = vperm.xlu2 %2570, %v2957_v10   ;;  %2591 = vset.pattern.permute.xlu0 %v2821_v54 }
  0xbd   : > { %2569 = vset.pattern.permute.xlu1 %v2817_v18  ;;  %1211 = vperm.xlu0 %2591, %v2921_v1  }
  0xbe   : > { %650 = vperm.xlu1 %2569, %v2957_v10   ;;  %931 = vmatpush.msrb.mxu3 %v914_v32  ;;  %v1109_v32 = vld [vmem:[#allocation2 + $0x240] sm:$0xff] }
  0xc0   : > { %v411_v50 = vpop.permute.xlu2 %410  ;;  %932 = vmatpush.msrb.mxu3 %v913_v38  ;;  %v1108_v38 = vld [vmem:[#allocation2 + $0x238] sm:$0xff] }
  0xc1   : > { %v3126_v56 = vpop.permute.xlu1 %383  ;;  %v381_v58 = vpop.permute.xlu0 %380  ;;  %vm433_vm2 = vcmp.eq.s32.totalorder %v411_v50, %v3088_v52  ;;  %v715_v50 = vld [vmem:[#allocation2 + $0x110] sm:$0xff] }
  0xc2   : > { %2220 = vmatmul.msk.f32.vlgmr.msra.gmra.mxu3 %vm433_vm2, %v2819_v57  ;;  %vm423_vm4 = vcmp.eq.s32.totalorder %v381_v58, %v3088_v52  ;;  %vm424_vm6 = vcmp.eq.s32.totalorder %v3126_v56, %v3088_v52  ;;  %v714_v58 = vld [vmem:[#allocation2 + $0x108] sm:$0xff]  ;;  %742 = vmatpush.msrb.mxu2 %v715_v50  ;;  %v909_v56 = vld [vmem:[#allocation2 + $0x190] sm:$0xff] }
  0xc3   : > { %2209 = vmatmul.msk.f32.gmra.mxu0 %vm422_vm3, %v2819_v57  ;;  %933 = vmatpush.msrb.mxu3 %v912_v40 }
  0xc4   : > { %847 = vperm.xlu2 %2570, %v2975_v15   ;;  %743 = vmatpush.msrb.mxu2 %v714_v58  ;;  %v1101_v58 = vld [vmem:[#allocation2 + $0x200] sm:$0xff] }
  0xc5   : > { %2592 = vset.pattern.permute.xlu0 %v2822_v33 }
  0xc6   : > { %653 = vperm.xlu1 %2569, %v2975_v15   ;;  %1396 = vperm.xlu0 %2592, %v2939_v6  }
  0xc7   : > { %744 = vmatpush.msrb.mxu2 %v713_v62  ;;  %v1309_v62 = vld [vmem:[#allocation2 + $0x2f0] sm:$0xff] }
  0xc8   : > { %v3137_v30 = vpop.permute.xlu2 %419 }
  0xc9   : > { %v390_v25 = vpop.permute.xlu1 %389  ;;  %v396_v27 = vpop.permute.xlu0 %395  ;;  %vm436_vm0 = vcmp.eq.s32.totalorder %v3137_v30, %v3088_v52  ;;  %v1111_v30 = vld [vmem:[#allocation2 + $0x250] sm:$0xff] }
  0xca   : > { %vm426_vm5 = vcmp.eq.s32.totalorder %v390_v25, %v3088_v52  ;;  %vm428_vm9 = vcmp.eq.s32.totalorder %v396_v27, %v3088_v52  ;;  %v1114_v25 = vld [vmem:[#allocation2 + $0x268] sm:$0xff]  ;;  %v1112_v27 = vld [vmem:[#allocation2 + $0x258] sm:$0xff] }
  0xcb   : > { %2210 = vmatmul.msk.f32.gmra.mxu0 %vm423_vm4, %v2819_v57  ;;  %2213 = vmatmul.msk.f32.gmra.mxu1 %vm426_vm5, %v2819_v57  ;;  %vm311_vm4 = vcmp.eq.s32.totalorder %v3033_v35, %v3088_v52  ;;  %vm312_vm5 = vcmp.eq.s32.totalorder %v3057_v42, %v3088_v52  ;;  %v1115_v42 = vld [vmem:[#allocation2 + $0x270] sm:$0xff] }
  0xcc   : > { %2573 = vset.pattern.permute.xlu2 %v2817_v18  ;;  %v911_v18 = vld [vmem:[#allocation2 + $0x1a0] sm:$0xff]  ;;  %1118 = vmatpush.msrb.mxu0 %v1115_v42 }
  0xcd   : > { %659 = vperm.xlu2 %2573, %v2969_v13   ;;  %934 = vmatpush.msrb.mxu3 %v911_v18  ;;  %v1698_v18 = vld [vmem:[#allocation2 + $0x3f8] sm:$0xff] }
  0xce   : > { %2572 = vset.pattern.permute.xlu1 %v2818_v20  ;;  %1411 = vperm.xlu0 %2592, %v2951_v9   ;;  %v2823_v9 = vmov 4  }
  0xcf   : > { %850 = vperm.xlu1 %2572, %v2972_v14   ;;  %935 = vmatpush.msrb.mxu3 %v910_v51  ;;  %v1102_v51 = vld [vmem:[#allocation2 + $0x208] sm:$0xff] }
  0xd0   : > { %1119 = vmatpush.msrb.mxu0 %v1114_v25  ;;  %v2704_v25 = vld [vmem:[%s2918_s16 + $0x30] sm:$0xff] }
  0xd1   : > { %v399_v48 = vpop.permute.xlu1 %398  ;;  %v405_v49 = vpop.permute.xlu0 %404  ;;  %936 = vmatpush.msrb.mxu3 %v909_v56 }
  0xd2   : > { %vm429_vm8 = vcmp.eq.s32.totalorder %v399_v48, %v3088_v52  ;;  %v3153_v20 = vpop.permute.xlu2 %623  ;;  %vm431_vm12 = vcmp.eq.s32.totalorder %v405_v49, %v3088_v52  ;;  %v1504_v49 = vld [vmem:[#allocation2 + $0x378] sm:$0xff] }
  0xd3   : > { %2211 = vmatmul.msk.f32.gmra.mxu0 %vm424_vm6, %v2819_v57  ;;  %2214 = vmatmul.msk.f32.gmra.mxu1 %vm427_vm7, %v2819_v57 }
  0xd4   : > { %2216 = vmatmul.msk.f32.vlgmr.msra.gmra.mxu2 %vm429_vm8, %v2819_v57  ;;  %937 = vmatpush.msrb.mxu3 %v908_v59  ;;  %vm313_vm8 = vcmp.eq.s32.totalorder %v3004_v19, %v3088_v52 }
  0xd5   : > { %662 = vperm.xlu2 %2573, %v2981_v16   ;;  %1505 = vmatpush.msra.mxu2 %v1504_v49  ;;  %v1496_v49 = vld [vmem:[#allocation2 + $0x338] sm:$0xff] }
  0xd6   : > { %938 = vmatpush.msrb.mxu3 %v907_v17  ;;  %2597 = vset.pattern.permute.xlu0 %v2823_v9  ;;  %v1307_v17 = vld [vmem:[#allocation2 + $0x2e0] sm:$0xff] }
  0xd7   : > { %853 = vperm.xlu1 %2572, %v2969_v13   ;;  %1011 = vperm.xlu0 %2597, %v2924_v2  }
  0xd8   : > { %1699 = vmatpush.msra.mxu3 %v1698_v18 }
  0xd9   : > { %v408_v61 = vpop.permute.xlu1 %407  ;;  %v414_v0 = vpop.permute.xlu0 %413 }
  0xda   : > { %vm434_vm10 = vcmp.eq.s32.totalorder %v414_v0, %v3088_v52  ;;  %v3163_v16 = vpop.permute.xlu2 %629  ;;  %vm432_vm1 = vcmp.eq.s32.totalorder %v408_v61, %v3088_v52  ;;  %v2703_v61 = vld [vmem:[%s2918_s16 + $0x28] sm:$0xff] }
  0xdb   : > { %2215 = vmatmul.msk.f32.gmra.mxu1 %vm428_vm9, %v2819_v57  ;;  %2221 = vmatmul.msk.f32.gmra.mxu3 %vm434_vm10, %v2819_v57  ;;  %vm666_vm9 = vcmp.eq.s32.totalorder %v3153_v20, %v3088_v52  ;;  %v1310_v20 = vld [vmem:[#allocation2 + $0x2f8] sm:$0xff]  ;;  %v1308_v0 = vld [vmem:[#allocation2 + $0x2e8] sm:$0xff] }
  0xdc   : > { %2217 = vmatmul.msk.f32.gmra.mxu2 %vm430_vm11, %v2819_v57  ;;  %vm314_vm11 = vcmp.eq.s32.totalorder %v3010_v24, %v3088_v52  ;;  %1311 = vmatpush.msra.mxu1 %v1310_v20 }
  0xdd   : > { %2575 = vset.pattern.permute.xlu2 %v2823_v9 }
  0xde   : > { %1005 = vperm.xlu2 %2575, %v2927_v3   ;;  %1312 = vmatpush.msra.mxu1 %v1309_v62  ;;  %v1687_v62 = vld [vmem:[#allocation2 + $0x3a0] sm:$0xff] }
  0xdf   : > { %2574 = vset.pattern.permute.xlu1 %v2822_v33  ;;  %1026 = vperm.xlu0 %2597, %v2948_v8  }
  0xe0   : > { %1393 = vperm.xlu1 %2574, %v2927_v3   ;;  %1313 = vmatpush.msra.mxu1 %v1308_v0 }
  0xe1   : > { %v417_v21 = vpop.permute.xlu1 %416 }
  0xe2   : > { %vm435_vm14 = vcmp.eq.s32.totalorder %v417_v21, %v3088_v52  ;;  %v3180_v31 = vpop.permute.xlu2 %817  ;;  %v618_v22 = vpop.permute.xlu0 %617  ;;  %1314 = vmatpush.msra.mxu1 %v1307_v17  ;;  %v1306_v21 = vld [vmem:[#allocation2 + $0x2d8] sm:$0xff] }
  0xe3   : > { %2222 = vmatmul.msk.f32.gmra.mxu3 %vm435_vm14, %v2819_v57  ;;  %2224 = vmatmul.msk.f32.vlgmr.msrb.gmra.mxu1 %vm309_vm13, %v2819_v57  ;;  %vm664_vm3 = vcmp.eq.s32.totalorder %v618_v22, %v3088_v52  ;;  %vm860_vm10 = vcmp.eq.s32.totalorder %v3180_v31, %v3088_v52  ;;  %vm315_vm14 = vcmp.eq.s32.totalorder %v3078_v47, %v3088_v52  ;;  %v1305_v31 = vld [vmem:[#allocation2 + $0x2d0] sm:$0xff]  ;;  %v1492_v17 = vld [vmem:[#allocation2 + $0x318] sm:$0xff] }
  0xe4   : > { %2218 = vmatmul.msk.f32.gmra.mxu2 %vm431_vm12, %v2819_v57  ;;  %1315 = vmatpush.msra.mxu1 %v1306_v21  ;;  %v1685_v21 = vld [vmem:[#allocation2 + $0x390] sm:$0xff] }
  0xe6   : > { %2577 = vset.pattern.permute.xlu2 %v2821_v54  ;;  %1316 = vmatpush.msra.mxu1 %v1305_v31 }
  0xe7   : > { %1199 = vperm.xlu2 %2577, %v2927_v3   ;;  %2606 = vset.pattern.permute.xlu0 %v2820_v26 }
  0xe8   : > { %2576 = vset.pattern.permute.xlu1 %v2820_v26  ;;  %1611 = vperm.xlu0 %2606, %v2945_v7  }
  0xe9   : > { %1587 = vperm.xlu1 %2576, %v2927_v3  }
  0xea   : > { %v621_v36 = vpop.permute.xlu1 %620  ;;  %v3194_v46 = vpop.permute.xlu2 %820 }
  0xeb   : > { %2223 = vmatmul.msk.f32.gmra.mxu3 %vm436_vm0, %v2819_v57  ;;  %2225 = vmatmul.msk.f32.gmra.mxu1 %vm310_vm15, %v2819_v57  ;;  %v812_v3 = vpop.permute.xlu0 %811  ;;  %vm665_vm6 = vcmp.eq.s32.totalorder %v621_v36, %v3088_v52  ;;  %vm861_vm13 = vcmp.eq.s32.totalorder %v3194_v46, %v3088_v52  ;;  %vm668_vm0 = vcmp.eq.s32.totalorder %v3163_v16, %v3088_v52  ;;  %v1502_v16 = vld [vmem:[#allocation2 + $0x368] sm:$0xff] }
  0xec   : > { %2219 = vmatmul.msk.f32.gmra.mxu2 %vm432_vm1, %v2819_v57  ;;  %vm858_vm2 = vcmp.eq.s32.totalorder %v812_v3, %v3088_v52  ;;  %vm316_vm1 = vcmp.eq.s32.totalorder %v3073_v45, %v3088_v52  ;;  %v1304_v36 = vld [vmem:[#allocation2 + $0x2c8] sm:$0xff]  ;;  %v1303_v3 = vld [vmem:[#allocation2 + $0x2c0] sm:$0xff] }
  0xed   : > { %1317 = vmatpush.msra.mxu1 %v1304_v36  ;;  %v1490_v36 = vld [vmem:[#allocation2 + $0x308] sm:$0xff] }
  0xef   : > { %2579 = vset.pattern.permute.xlu2 %v2820_v26  ;;  %1318 = vmatpush.msra.mxu1 %v1303_v3 }
  0xf0   : > { %1590 = vperm.xlu2 %2579, %v2939_v6   ;;  %2611 = vset.pattern.permute.xlu0 %v2821_v54 }
  0xf1   : > { %2578 = vset.pattern.permute.xlu1 %v2823_v9  ;;  %1226 = vperm.xlu0 %2611, %v2963_v12  }
  0xf2   : > { %1008 = vperm.xlu1 %2578, %v2939_v6   ;;  %v627_v8 = vpop.permute.xlu1 %626 }
  0xf3   : > { %2226 = vmatmul.msk.f32.gmra.mxu1 %vm311_vm4, %v2819_v57  ;;  %2288 = vmatmul.msk.f32.vlgmr.msrb.gmra.mxu3 %vm858_vm2, %v2819_v57  ;;  %v3212_v43 = vpop.permute.xlu2 %635  ;;  %v824_v28 = vpop.permute.xlu0 %823  ;;  %vm667_vm12 = vcmp.eq.s32.totalorder %v627_v8, %v3088_v52  ;;  %vm317_vm4 = vcmp.eq.s32.totalorder %v3017_v29, %v3088_v52  ;;  %v1697_v29 = vld [vmem:[#allocation2 + $0x3f0] sm:$0xff]  ;;  %v1501_v8 = vld [vmem:[#allocation2 + $0x360] sm:$0xff] }
  0xf4   : > { %2256 = vmatmul.msk.f32.vlgmr.msrb.gmra.mxu2 %vm664_vm3, %v2819_v57  ;;  %vm862_vm15 = vcmp.eq.s32.totalorder %v824_v28, %v3088_v52  ;;  %1700 = vmatpush.msra.mxu3 %v1697_v29  ;;  %v1298_v28 = vld [vmem:[#allocation2 + $0x298] sm:$0xff]  ;;  %v1493_v29 = vld [vmem:[#allocation2 + $0x320] sm:$0xff] }
  0xf8   : > { %2581 = vset.pattern.permute.xlu2 %v2822_v33 }
  0xf9   : > { %1399 = vperm.xlu2 %2581, %v2924_v2   ;;  %2616 = vset.pattern.permute.xlu0 %v2822_v33 }
  0xfa   : > { %2580 = vset.pattern.permute.xlu1 %v2821_v54  ;;  %1426 = vperm.xlu0 %2616, %v2957_v10  }
  0xfb   : > { %1202 = vperm.xlu1 %2580, %v2939_v6   ;;  %v815_v7 = vpop.permute.xlu1 %814  ;;  %2227 = vmatmul.msk.f32.gmra.mxu1 %vm312_vm5, %v2819_v57  ;;  %v1113_v6 = vld [vmem:[#allocation2 + $0x260] sm:$0xff]  ;;  %v3261_v37 = vpop.permute.xlu0 %829 }
  0xfc   : > { %vm859_vm7 = vcmp.eq.s32.totalorder %v815_v7, %v3088_v52  ;;  %2257 = vmatmul.msk.f32.gmra.mxu2 %vm665_vm6, %v2819_v57  ;;  %v3226_v35 = vpop.permute.xlu2 %832  ;;  %1120 = vmatpush.msrb.mxu0 %v1113_v6  ;;  %vm864_vm5 = vcmp.eq.s32.totalorder %v3261_v37, %v3088_v52  ;;  %vm670_vm6 = vcmp.eq.s32.totalorder %v3212_v43, %v3088_v52  ;;  %v1302_v43 = vld [vmem:[#allocation2 + $0x2b8] sm:$0xff]  ;;  %v1695_v7 = vld [vmem:[#allocation2 + $0x3e0] sm:$0xff]  ;;  %v1498_v37 = vld [vmem:[#allocation2 + $0x348] sm:$0xff] }
  0xfd   : > { %2289 = vmatmul.msk.f32.gmra.mxu3 %vm859_vm7, %v2819_v57  ;;  %vm318_vm7 = vcmp.eq.s32.totalorder %v3093_v55, %v3088_v52  ;;  %v1696_v55 = vld [vmem:[#allocation2 + $0x3e8] sm:$0xff]  ;;  %1319 = vmatpush.msra.mxu1 %v1302_v43  ;;  %v1500_v6 = vld [vmem:[#allocation2 + $0x358] sm:$0xff] }
  0xfe   : > { %1121 = vmatpush.msrb.mxu0 %v1112_v27  ;;  %1701 = vmatpush.msra.mxu3 %v1696_v55  ;;  %v1299_v27 = vld [vmem:[#allocation2 + $0x2a0] sm:$0xff]  ;;  %v2707_v43 = vld [vmem:[%s2918_s16 + $0x48] sm:$0xff] }
 0x100   : > { %1122 = vmatpush.msrb.mxu0 %v1111_v30  ;;  %1702 = vmatpush.msra.mxu3 %v1695_v7  ;;  %v1694_v30 = vld [vmem:[#allocation2 + $0x3d8] sm:$0xff] }
 0x101   : > { %2583 = vset.pattern.permute.xlu2 %v2821_v54 }
 0x102   : > { %1205 = vperm.xlu2 %2583, %v2924_v2   ;;  %2621 = vset.pattern.permute.xlu0 %v2823_v9 }
 0x103   : > { %2582 = vset.pattern.permute.xlu1 %v2820_v26  ;;  %2228 = vmatmul.msk.f32.gmra.mxu1 %vm313_vm8, %v2819_v57 }
 0x104   : > { %2258 = vmatmul.msk.f32.gmra.mxu2 %vm666_vm9, %v2819_v57  ;;  %1593 = vperm.xlu1 %2582, %v2924_v2   ;;  %v633_v12 = vpop.permute.xlu1 %632  ;;  %v1110_v2 = vld [vmem:[#allocation2 + $0x248] sm:$0xff]  ;;  %v3281_v48 = vpop.permute.xlu0 %641  ;;  %vm865_vm9 = vcmp.eq.s32.totalorder %v3226_v35, %v3088_v52 }
 0x105   : > { %2290 = vmatmul.msk.f32.gmra.mxu3 %vm860_vm10, %v2819_v57  ;;  %v3243_v19 = vpop.permute.xlu2 %644  ;;  %1123 = vmatpush.msrb.mxu0 %v1110_v2  ;;  %vm669_vm2 = vcmp.eq.s32.totalorder %v633_v12, %v3088_v52  ;;  %vm672_vm10 = vcmp.eq.s32.totalorder %v3281_v48, %v3088_v52  ;;  %v1499_v2 = vld [vmem:[#allocation2 + $0x350] sm:$0xff]  ;;  %v1692_v48 = vld [vmem:[#allocation2 + $0x3c8] sm:$0xff] }
 0x106   : > { %1041 = vperm.xlu0 %2621, %v2975_v15   ;;  %v1106_v15 = vld [vmem:[#allocation2 + $0x228] sm:$0xff]  ;;  %1703 = vmatpush.msra.mxu3 %v1694_v30 }
 0x107   : > { %1124 = vmatpush.msrb.mxu0 %v1109_v32  ;;  %v1296_v32 = vld [vmem:[#allocation2 + $0x288] sm:$0xff] }
 0x109   : > { %1125 = vmatpush.msrb.mxu0 %v1108_v38 }
 0x10a   : > { %2585 = vset.pattern.permute.xlu2 %v2823_v9 }
 0x10b   : > { %2229 = vmatmul.msk.f32.gmra.mxu1 %vm314_vm11, %v2819_v57  ;;  %1014 = vperm.xlu2 %2585, %v2936_v5   ;;  %vm319_vm11 = vcmp.eq.s32.totalorder %v3090_v53, %v3088_v52  ;;  %v1301_v53 = vld [vmem:[#allocation2 + $0x2b0] sm:$0xff] }
 0x10c   : > { %2259 = vmatmul.msk.f32.gmra.mxu2 %vm667_vm12, %v2819_v57  ;;  %2584 = vset.pattern.permute.xlu1 %v2822_v33  ;;  %v3305_v56 = vpop.permute.xlu0 %656 }
 0x10d   : > { %1402 = vperm.xlu1 %2584, %v2936_v5   ;;  %v827_v10 = vpop.permute.xlu1 %826  ;;  %2291 = vmatmul.msk.f32.gmra.mxu3 %vm861_vm13, %v2819_v57  ;;  %v3259_v24 = vpop.permute.xlu2 %647 }
 0x10e   : > { %1126 = vmatpush.msrb.mxu0 %v1107_v39  ;;  %2626 = vset.pattern.permute.xlu0 %v2820_v26  ;;  %vm863_vm3 = vcmp.eq.s32.totalorder %v827_v10, %v3088_v52  ;;  %v2705_v39 = vld [vmem:[%s2918_s16 + $0x38] sm:$0xff] }
 0x10f   : > { %1626 = vperm.xlu0 %2626, %v2972_v14   ;;  %v1103_v14 = vld [vmem:[#allocation2 + $0x210] sm:$0xff]  ;;  %1320 = vmatpush.msra.mxu1 %v1301_v53 }
 0x110   : > { %1127 = vmatpush.msrb.mxu0 %v1106_v15 }
 0x111   : > { %1321 = vmatpush.msra.mxu1 %v1300_v23 }
 0x112   : > { %1128 = vmatpush.msrb.mxu0 %v1105_v44  ;;  %v1295_v44 = vld [vmem:[#allocation2 + $0x280] sm:$0xff] }
 0x113   : > { %2230 = vmatmul.msk.f32.gmra.mxu1 %vm315_vm14, %v2819_v57  ;;  %2588 = vset.pattern.permute.xlu2 %v2822_v33  ;;  %vm320_vm14 = vcmp.eq.s32.totalorder %v3031_v34, %v3088_v52  ;;  %v1297_v34 = vld [vmem:[#allocation2 + $0x290] sm:$0xff] }
 0x114   : > { %2260 = vmatmul.msk.f32.gmra.mxu2 %vm668_vm0, %v2819_v57  ;;  %1405 = vperm.xlu2 %2588, %v2921_v1  }
 0x115   : > { %2587 = vset.pattern.permute.xlu1 %v2821_v54  ;;  %2292 = vmatmul.msk.f32.gmra.mxu3 %vm862_vm15, %v2819_v57  ;;  %vm673_vm15 = vcmp.eq.s32.totalorder %v3243_v19, %v3088_v52 }
 0x116   : > { %1208 = vperm.xlu1 %2587, %v2936_v5   ;;  %v3277_v47 = vpop.permute.xlu1 %638  ;;  %v3279_v40 = vpop.permute.xlu2 %844  ;;  %v1104_v5 = vld [vmem:[#allocation2 + $0x218] sm:$0xff]  ;;  %1322 = vmatpush.msra.mxu1 %v1299_v27 }
 0x117   : > { %1129 = vmatpush.msrb.mxu0 %v1104_v5  ;;  %2631 = vset.pattern.permute.xlu0 %v2821_v54  ;;  %vm671_vm8 = vcmp.eq.s32.totalorder %v3277_v47, %v3088_v52  ;;  %v1693_v47 = vld [vmem:[#allocation2 + $0x3d0] sm:$0xff]  ;;  %v1497_v5 = vld [vmem:[#allocation2 + $0x340] sm:$0xff] }
 0x118   : > { %1241 = vperm.xlu0 %2631, %v2969_v13   ;;  %1323 = vmatpush.msra.mxu1 %v1298_v28 }
 0x119   : > { %1130 = vmatpush.msrb.mxu0 %v1103_v14  ;;  %1704 = vmatpush.msra.mxu3 %v1693_v47  ;;  %v1690_v14 = vld [vmem:[#allocation2 + $0x3b8] sm:$0xff] }
 0x11a   : > { %1324 = vmatpush.msra.mxu1 %v1297_v34 }
 0x11b   : > { %2231 = vmatmul.msk.f32.gmra.mxu1 %vm316_vm1, %v2819_v57  ;;  %1131 = vmatpush.msrb.mxu0 %v1102_v51  ;;  %vm321_vm1 = vcmp.eq.s32.totalorder %v3108_v63, %v3088_v52  ;;  %v1691_v63 = vld [vmem:[#allocation2 + $0x3c0] sm:$0xff]  ;;  %v1495_v51 = vld [vmem:[#allocation2 + $0x330] sm:$0xff] }
 0x11c   : > { %2261 = vmatmul.msk.f32.gmra.mxu2 %vm669_vm2, %v2819_v57  ;;  %2590 = vset.pattern.permute.xlu2 %v2820_v26 }
 0x11d   : > { %2293 = vmatmul.msk.f32.gmra.mxu3 %vm863_vm3, %v2819_v57  ;;  %1599 = vperm.xlu2 %2590, %v2921_v1   ;;  %vm674_vm3 = vcmp.eq.s32.totalorder %v3259_v24, %v3088_v52 }
 0x11e   : > { %2589 = vset.pattern.permute.xlu1 %v2823_v9  ;;  %v3295_v45 = vpop.permute.xlu2 %847  ;;  %1132 = vmatpush.msrb.mxu0 %v1101_v58  ;;  %v1689_v58 = vld [vmem:[#allocation2 + $0x3b0] sm:$0xff] }
 0x11f   : > { %1017 = vperm.xlu1 %2589, %v2921_v1   ;;  %v3298_v50 = vpop.permute.xlu1 %835  ;;  %v1503_v1 = vld [vmem:[#allocation2 + $0x370] sm:$0xff]  ;;  %1325 = vmatpush.msra.mxu1 %v1296_v32 }
 0x120   : > { %1506 = vmatpush.msra.mxu2 %v1503_v1  ;;  %2636 = vset.pattern.permute.xlu0 %v2820_v26  ;;  %vm866_vm12 = vcmp.eq.s32.totalorder %v3298_v50, %v3088_v52  ;;  %v1688_v1 = vld [vmem:[#allocation2 + $0x3a8] sm:$0xff] }
 0x121   : > { %1326 = vmatpush.msra.mxu1 %v1295_v44  ;;  %1705 = vmatpush.msra.mxu3 %v1692_v48 }
 0x122   : > { %1507 = vmatpush.msra.mxu2 %v1502_v16  ;;  %v1491_v16 = vld [vmem:[#allocation2 + $0x310] sm:$0xff] }
 0x123   : > { %2232 = vmatmul.msk.f32.gmra.mxu1 %vm317_vm4, %v2819_v57  ;;  %1706 = vmatpush.msra.mxu3 %v1691_v63  ;;  %vm322_vm4 = vcmp.eq.s32.totalorder %v3104_v60, %v3088_v52  ;;  %v1494_v60 = vld [vmem:[#allocation2 + $0x328] sm:$0xff] }
 0x124   : > { %2262 = vmatmul.msk.f32.gmra.mxu2 %vm670_vm6, %v2819_v57  ;;  %vm869_vm6 = vcmp.eq.s32.totalorder %v3279_v40, %v3088_v52  ;;  %v2706_v40 = vld [vmem:[%s2918_s16 + $0x40] sm:$0xff] }
 0x125   : > { %2294 = vmatmul.msk.f32.gmra.mxu3 %vm864_vm5, %v2819_v57  ;;  %2594 = vset.pattern.permute.xlu2 %v2823_v9 }
 0x126   : > { %1020 = vperm.xlu2 %2594, %v2933_v4   ;;  %v3330_v4 = vpop.permute.xlu0 %841  ;;  %1508 = vmatpush.msra.mxu2 %v1501_v8  ;;  %v1489_v8 = vld [vmem:[#allocation2 + $0x300] sm:$0xff] }
 0x127   : > { %2593 = vset.pattern.permute.xlu1 %v2822_v33  ;;  %v3316_v13 = vpop.permute.xlu1 %838  ;;  %v3318_v59 = vpop.permute.xlu2 %659  ;;  %vm868_vm2 = vcmp.eq.s32.totalorder %v3330_v4, %v3088_v52  ;;  %1707 = vmatpush.msra.mxu3 %v1690_v14  ;;  %v1686_v4 = vld [vmem:[#allocation2 + $0x398] sm:$0xff] }
 0x128   : > { %1408 = vperm.xlu1 %2593, %v2703_v61   ;;  %1509 = vmatpush.msra.mxu2 %v1500_v6  ;;  %vm867_vm0 = vcmp.eq.s32.totalorder %v3316_v13, %v3088_v52  ;;  %v3366_v19 = vpop.f32.mrf.mxu1 }
 0x129   : > { %1708 = vmatpush.msra.mxu3 %v1689_v58 }
 0x12a   : > { %1510 = vmatpush.msra.mxu2 %v1499_v2  ;;  %v2708_v2 = vld [vmem:[%s2918_s16 + $0x50] sm:$0xff] }
 0x12b   : > { %2233 = vmatmul.msk.f32.gmra.mxu1 %vm318_vm7, %v2819_v57  ;;  %1709 = vmatpush.msra.mxu3 %v1688_v1  ;;  %vm323_vm7 = vcmp.eq.s32.totalorder %v3055_v41, %v3088_v52 }
 0x12c   : > { %2263 = vmatmul.msk.f32.gmra.mxu2 %vm671_vm8, %v2819_v57 }
 0x12d   : > { %2295 = vmatmul.msk.f32.gmra.mxu3 %vm865_vm9, %v2819_v57  ;;  %1511 = vmatpush.msra.mxu2 %v1498_v37  ;;  %vm870_vm9 = vcmp.eq.s32.totalorder %v3295_v45, %v3088_v52  ;;  %v1684_v45 = vld [vmem:[#allocation2 + $0x388] sm:$0xff] }
 0x12e   : > { %2596 = vset.pattern.permute.xlu2 %v2821_v54  ;;  %v3348_v35 = vpop.permute.xlu0 %856  ;;  %1710 = vmatpush.msra.mxu3 %v1687_v62 }
 0x12f   : > { %v3334_v22 = vpop.permute.xlu2 %662  ;;  %1214 = vperm.xlu2 %2596, %v2703_v61   ;;  %1512 = vmatpush.msra.mxu2 %v1497_v5 }
 0x130   : > { %2595 = vset.pattern.permute.xlu1 %v2820_v26  ;;  %v3337_v46 = vpop.permute.xlu1 %650  ;;  %1711 = vmatpush.msra.mxu3 %v1686_v4 }
 0x131   : > { %1602 = vperm.xlu1 %2595, %v2703_v61   ;;  %1513 = vmatpush.msra.mxu2 %v1496_v49  ;;  %vm675_vm5 = vcmp.eq.s32.totalorder %v3337_v46, %v3088_v52  ;;  %v2709_v49 = vld [vmem:[%s2918_s16 + $0x58] sm:$0xff] }
 0x132   : > { %1712 = vmatpush.msra.mxu3 %v1685_v21 }
 0x133   : > { %2234 = vmatmul.msk.f32.gmra.mxu1 %vm319_vm11, %v2819_v57  ;;  %1514 = vmatpush.msra.mxu2 %v1495_v51  ;;  %vm324_vm11 = vcmp.eq.s32.totalorder %v3116_v11, %v3088_v52 }
 0x134   : > { %2264 = vmatmul.msk.f32.gmra.mxu2 %vm672_vm10, %v2819_v57  ;;  %vm677_vm10 = vcmp.eq.s32.totalorder %v3305_v56, %v3088_v52  ;;  %1713 = vmatpush.msra.mxu3 %v1684_v45  ;;  %v1683_v56 = vld [vmem:[#allocation2 + $0x380] sm:$0xff] }
 0x135   : > { %2296 = vmatmul.msk.f32.gmra.mxu3 %vm866_vm12, %v2819_v57  ;;  %1515 = vmatpush.msra.mxu2 %v1494_v60  ;;  %v2710_v60 = vld [vmem:[%s2918_s16 + $0x60] sm:$0xff] }
 0x136   : > { %v3368_v10 = vpop.permute.xlu0 %1596  ;;  %1714 = vmatpush.msra.mxu3 %v1683_v56  ;;  %v1831_v56 = vld [vmem:[%s4003_s3 + $0x78] sm:$0xff] }
 0x137   : > { %2599 = vset.pattern.permute.xlu2 %v2820_v26  ;;  %1516 = vmatpush.msra.mxu2 %v1493_v29 }
 0x138   : > { %v3351_v42 = vpop.permute.xlu1 %653  ;;  %1605 = vperm.xlu2 %2599, %v2704_v25   ;;  %v1006_v12 = vpop.permute.xlu2 %1005  ;;  %1836 = vmatpush.msra.mxu0 %v1831_v56 }
 0x139   : > { %2598 = vset.pattern.permute.xlu1 %v2823_v9  ;;  %vm1052_vm13 = vcmp.eq.s32.totalorder %v1006_v12, %v3088_v52  ;;  %vm676_vm8 = vcmp.eq.s32.totalorder %v3351_v42, %v3088_v52  ;;  %1517 = vmatpush.msra.mxu2 %v1492_v17 }
 0x13a   : > { %1023 = vperm.xlu1 %2598, %v2704_v25   ;;  %2320 = vmatmul.msk.f32.vlgmr.msrb.gmra.mxu0 %vm1052_vm13, %v2819_v57 }
 0x13b   : > { %2235 = vmatmul.msk.f32.gmra.mxu1 %vm320_vm14, %v2819_v57  ;;  %1518 = vmatpush.msra.mxu2 %v1491_v16  ;;  %vm678_vm14 = vcmp.eq.s32.totalorder %v3318_v59, %v3088_v52 }
 0x13c   : > { %2265 = vmatmul.msk.f32.gmra.mxu2 %vm673_vm15, %v2819_v57 }
 0x13d   : > { %2297 = vmatmul.msk.f32.gmra.mxu3 %vm867_vm0, %v2819_v57  ;;  %1519 = vmatpush.msra.mxu2 %v1490_v36 }
 0x13e   : > { %v3393_v20 = vpop.permute.xlu0 %1211 }
 0x13f   : > { %1520 = vmatpush.msra.mxu2 %v1489_v8 }
 0x140   : > { %2601 = vset.pattern.permute.xlu2 %v2822_v33 }
 0x141   : > { %v3371_v38 = vpop.permute.xlu1 %850  ;;  %1414 = vperm.xlu2 %2601, %v2705_v39   ;;  %v3374_v15 = vpop.permute.xlu2 %1199 }
 0x142   : > { %2600 = vset.pattern.permute.xlu1 %v2821_v54  ;;  %vm871_vm12 = vcmp.eq.s32.totalorder %v3371_v38, %v3088_v52  ;;  %vm1246_vm13 = vcmp.eq.s32.totalorder %v3374_v15, %v3088_v52 }
 0x143   : > { %1217 = vperm.xlu1 %2600, %v2704_v25   ;;  %2236 = vmatmul.msk.f32.gmra.mxu1 %vm321_vm1, %v2819_v57  ;;  %vm873_vm1 = vcmp.eq.s32.totalorder %v3348_v35, %v3088_v52 }
 0x144   : > { %2266 = vmatmul.msk.f32.gmra.mxu2 %vm674_vm3, %v2819_v57 }
 0x145   : > { %2298 = vmatmul.msk.f32.gmra.mxu3 %vm868_vm2, %v2819_v57  ;;  %v3425_v55 = vpop.f32.mrf.mxu3  ;;  %vm679_vm2 = vcmp.eq.s32.totalorder %v3334_v22, %v3088_v52 }
 0x146   : > { %v3422_v41 = vpop.permute.xlu0 %1396 }
 0x148   : > { %v3386_v18 = vpop.f32.mrf.mxu1 }
 0x149   : > { %v3388_v24 = vpop.permute.xlu1 %853  ;;  %2603 = vset.pattern.permute.xlu2 %v2821_v54 }
 0x14a   : > { %1220 = vperm.xlu2 %2603, %v2705_v39   ;;  %v3395_v50 = vpop.permute.xlu2 %1590  ;;  %vm872_vm15 = vcmp.eq.s32.totalorder %v3388_v24, %v3088_v52 }
 0x14b   : > { %2602 = vset.pattern.permute.xlu1 %v2820_v26  ;;  %2237 = vmatmul.msk.f32.gmra.mxu1 %vm322_vm4, %v2819_v57 }
 0x14c   : > { %2267 = vmatmul.msk.f32.gmra.mxu2 %vm675_vm5, %v2819_v57  ;;  %1608 = vperm.xlu1 %2602, %v2705_v39  }
 0x14d   : > { %2299 = vmatmul.msk.f32.gmra.mxu3 %vm869_vm6, %v2819_v57 }
 0x14e   : > { %v3445_v53 = vpop.permute.xlu0 %1411 }
 0x150   : > { %v3405_v13 = vpop.f32.mrf.mxu1 }
 0x152   : > { %v3407_v61 = vpop.permute.xlu1 %1393  ;;  %2605 = vset.pattern.permute.xlu2 %v2823_v9 }
 0x153   : > { %2238 = vmatmul.msk.f32.gmra.mxu1 %vm323_vm7, %v2819_v57  ;;  %1029 = vperm.xlu2 %2605, %v2706_v40   ;;  %v3416_v0 = vpop.permute.xlu2 %1399  ;;  %vm1440_vm5 = vcmp.eq.s32.totalorder %v3407_v61, %v3088_v52 }
 0x154   : > { %2268 = vmatmul.msk.f32.gmra.mxu2 %vm676_vm8, %v2819_v57  ;;  %2604 = vset.pattern.permute.xlu1 %v2822_v33 }
 0x155   : > { %1417 = vperm.xlu1 %2604, %v2706_v40   ;;  %2300 = vmatmul.msk.f32.gmra.mxu3 %vm870_vm9, %v2819_v57  ;;  %vm1441_vm9 = vcmp.eq.s32.totalorder %v3422_v41, %v3088_v52  ;;  %v2711_v41 = vld [vmem:[%s2918_s16 + $0x68] sm:$0xff] }
 0x156   : > { %v1012_v28 = vpop.permute.xlu0 %1011 }
 0x157   : > { %v3427_v31 = vpop.f32.mrf.mxu2  ;;  %vm1054_vm3 = vcmp.eq.s32.totalorder %v1012_v28, %v3088_v52 }
 0x158   : > { %v3429_v46 = vpop.f32.mrf.mxu1 }
 0x15b   : > { %v1588_v3 = vpop.permute.xlu1 %1587  ;;  %2239 = vmatmul.msk.f32.gmra.mxu1 %vm324_vm11, %v2819_v57  ;;  %2608 = vset.pattern.permute.xlu2 %v2822_v33  ;;  %vm1442_vm11 = vcmp.eq.s32.totalorder %v3416_v0, %v3088_v52 }
 0x15c   : > { %2269 = vmatmul.msk.f32.gmra.mxu2 %vm677_vm10, %v2819_v57  ;;  %1420 = vperm.xlu2 %2608, %v2707_v43   ;;  %v1206_v7 = vpop.permute.xlu2 %1205  ;;  %vm1634_vm7 = vcmp.eq.s32.totalorder %v1588_v3, %v3088_v52  ;;  %vm1635_vm10 = vcmp.eq.s32.totalorder %v3395_v50, %v3088_v52  ;;  %v2712_v3 = vld [vmem:[%s2918_s16 + $0x70] sm:$0xff] }
 0x15d   : > { %2607 = vset.pattern.permute.xlu1 %v2821_v54  ;;  %2301 = vmatmul.msk.f32.gmra.mxu3 %vm871_vm12, %v2819_v57  ;;  %vm1248_vm8 = vcmp.eq.s32.totalorder %v1206_v7, %v3088_v52 }
 0x15e   : > { %1223 = vperm.xlu1 %2607, %v2706_v40   ;;  %v3443_v11 = vpop.f32.mrf.mxu3 }
 0x15f   : > { %v3447_v23 = vpop.f32.mrf.mxu2 }
 0x160   : > { %v3449_v42 = vpop.f32.mrf.mxu1 }
 0x163   : > { %2352 = vmatmul.msk.f32.vlgmr.msra.gmra.mxu1 %vm1246_vm13, %v2819_v57 }
 0x164   : > { %2270 = vmatmul.msk.f32.gmra.mxu2 %vm678_vm14, %v2819_v57  ;;  %v1009_v25 = vpop.permute.xlu1 %1008  ;;  %2610 = vset.pattern.permute.xlu2 %v2820_v26  ;;  %vm1637_vm14 = vcmp.eq.s32.totalorder %v3368_v10, %v3088_v52 }
 0x165   : > { %vm1053_vm0 = vcmp.eq.s32.totalorder %v1009_v25, %v3088_v52  ;;  %2302 = vmatmul.msk.f32.gmra.mxu3 %vm872_vm15, %v2819_v57  ;;  %1614 = vperm.xlu2 %2610, %v2707_v43   ;;  %v1015_v59 = vpop.permute.xlu2 %1014 }
 0x166   : > { %2609 = vset.pattern.permute.xlu1 %v2823_v9  ;;  %v3463_v6 = vpop.f32.mrf.mxu3  ;;  %2321 = vmatmul.msk.f32.gmra.mxu0 %vm1053_vm0, %v2819_v57  ;;  %vm1055_vm6 = vcmp.eq.s32.totalorder %v1015_v59, %v3088_v52  ;;  %vm1250_vm0 = vcmp.eq.s32.totalorder %v3393_v20, %v3088_v52 }
 0x167   : > { %v3466_v12 = vpop.f32.mrf.mxu2  ;;  %1032 = vperm.xlu1 %2609, %v2707_v43  }
 0x168   : > { %v3468_v27 = vpop.f32.mrf.mxu1 }
 0x16c   : > { %2271 = vmatmul.msk.f32.gmra.mxu2 %vm679_vm2, %v2819_v57 }
 0x16d   : > { %v1203_v30 = vpop.permute.xlu1 %1202  ;;  %2303 = vmatmul.msk.f32.gmra.mxu3 %vm873_vm1, %v2819_v57  ;;  %2613 = vset.pattern.permute.xlu2 %v2823_v9 }
 0x16e   : > { %vm1247_vm4 = vcmp.eq.s32.totalorder %v1203_v30, %v3088_v52  ;;  %v3479_v34 = vpop.f32.mrf.mxu3  ;;  %2322 = vmatmul.msk.f32.gmra.mxu0 %vm1054_vm3, %v2819_v57  ;;  %1035 = vperm.xlu2 %2613, %v2708_v2   ;;  %v3483_v35 = vpop.permute.xlu2 %1405 }
 0x16f   : > { %v3485_v22 = vpop.f32.mrf.mxu2  ;;  %2612 = vset.pattern.permute.xlu1 %v2822_v33  ;;  %2353 = vmatmul.msk.f32.gmra.mxu1 %vm1247_vm4, %v2819_v57  ;;  %vm1444_vm3 = vcmp.eq.s32.totalorder %v3483_v35, %v3088_v52  ;;  %v1027_v30 = vpop.permute.xlu0 %1026  ;;  %v1830_v35 = vld [vmem:[%s4003_s3 + $0x70] sm:$0xff] }
 0x170   : > { %1423 = vperm.xlu1 %2612, %v2708_v2   ;;  %v3489_v32 = vpop.f32.mrf.mxu1  ;;  %1837 = vmatpush.msra.mxu0 %v1830_v35 }
 0x174   : > { %2384 = vmatmul.msk.f32.vlgmr.msra.gmra.mxu2 %vm1440_vm5, %v2819_v57 }
 0x175   : > { %2416 = vmatmul.msk.f32.vlgmr.msra.gmra.mxu3 %vm1634_vm7, %v2819_v57  ;;  %vm1446_vm7 = vcmp.eq.s32.totalorder %v3445_v53, %v3088_v52 }
 0x176   : > { %v1594_v37 = vpop.permute.xlu1 %1593  ;;  %2323 = vmatmul.msk.f32.gmra.mxu0 %vm1055_vm6, %v2819_v57  ;;  %v3499_v38 = vpop.f32.mrf.mxu3  ;;  %2615 = vset.pattern.permute.xlu2 %v2821_v54 }
 0x177   : > { %v3502_v39 = vpop.f32.mrf.mxu2  ;;  %2354 = vmatmul.msk.f32.gmra.mxu1 %vm1248_vm8, %v2819_v57  ;;  %1229 = vperm.xlu2 %2615, %v2708_v2   ;;  %v1600_v15 = vpop.permute.xlu2 %1599  ;;  %vm1636_vm12 = vcmp.eq.s32.totalorder %v1594_v37, %v3088_v52 }
 0x178   : > { %2614 = vset.pattern.permute.xlu1 %v2820_v26  ;;  %v3506_v47 = vpop.f32.mrf.mxu1  ;;  %vm1638_vm1 = vcmp.eq.s32.totalorder %v1600_v15, %v3088_v52 }
 0x179   : > { %1617 = vperm.xlu1 %2614, %v2708_v2  }
 0x17c   : > { %2385 = vmatmul.msk.f32.gmra.mxu2 %vm1441_vm9, %v2819_v57 }
 0x17d   : > { %2417 = vmatmul.msk.f32.gmra.mxu3 %vm1635_vm10, %v2819_v57 }
 0x17f   : > { %v3514_v44 = vpop.f32.mrf.mxu2  ;;  %v1403_v48 = vpop.permute.xlu1 %1402  ;;  %2618 = vset.pattern.permute.xlu2 %v2820_v26 }
 0x180   : > { %v3517_v5 = vpop.f32.mrf.mxu1  ;;  %v3519_v63 = vpop.f32.mrf.mxu3  ;;  %1620 = vperm.xlu2 %2618, %v2709_v49   ;;  %vm1443_vm15 = vcmp.eq.s32.totalorder %v1403_v48, %v3088_v52 }
 0x181   : > { %2617 = vset.pattern.permute.xlu1 %v2823_v9  ;;  %v1021_v14 = vpop.permute.xlu2 %1020 }
 0x182   : > { %1038 = vperm.xlu1 %2617, %v2709_v49   ;;  %vm1057_vm5 = vcmp.eq.s32.totalorder %v1021_v14, %v3088_v52 }
 0x184   : > { %2386 = vmatmul.msk.f32.gmra.mxu2 %vm1442_vm11, %v2819_v57 }
 0x185   : > { %2418 = vmatmul.msk.f32.gmra.mxu3 %vm1636_vm12, %v2819_v57  ;;  %vm1059_vm12 = vcmp.eq.s32.totalorder %v1027_v30, %v3088_v52 }
 0x187   : > { %v3528_v24 = vpop.f32.mrf.mxu2 }
 0x188   : > { %v1209_v50 = vpop.permute.xlu1 %1208  ;;  %v3530_v51 = vpop.f32.mrf.mxu1  ;;  %2620 = vset.pattern.permute.xlu2 %v2822_v33 }
 0x189   : > { %vm1249_vm13 = vcmp.eq.s32.totalorder %v1209_v50, %v3088_v52  ;;  %v3534_v58 = vpop.f32.mrf.mxu3  ;;  %1429 = vperm.xlu2 %2620, %v2710_v60   ;;  %v1215_v1 = vpop.permute.xlu2 %1214 }
 0x18a   : > { %2619 = vset.pattern.permute.xlu1 %v2821_v54  ;;  %2355 = vmatmul.msk.f32.gmra.mxu1 %vm1249_vm13, %v2819_v57  ;;  %vm1251_vm4 = vcmp.eq.s32.totalorder %v1215_v1, %v3088_v52 }
 0x18b   : > { %1232 = vperm.xlu1 %2619, %v2709_v49   ;;  %v2713_v49 = vld [vmem:[%s2918_s16 + $0x78] sm:$0xff] }
 0x18c   : > { %2387 = vmatmul.msk.f32.gmra.mxu2 %vm1443_vm15, %v2819_v57 }
 0x18d   : > { %2419 = vmatmul.msk.f32.gmra.mxu3 %vm1637_vm14, %v2819_v57 }
 0x18f   : > { %v3546_v29 = vpop.f32.mrf.mxu2 }
 0x190   : > { %v3548_v62 = vpop.f32.mrf.mxu1 }
 0x191   : > { %v3550_v61 = vpop.f32.mrf.mxu3  ;;  %v1018_v10 = vpop.permute.xlu1 %1017  ;;  %2623 = vset.pattern.permute.xlu2 %v2821_v54 }
 0x192   : > { %vm1056_vm2 = vcmp.eq.s32.totalorder %v1018_v10, %v3088_v52  ;;  %2356 = vmatmul.msk.f32.gmra.mxu1 %vm1250_vm0, %v2819_v57  ;;  %1235 = vperm.xlu2 %2623, %v2710_v60   ;;  %v1606_v40 = vpop.permute.xlu2 %1605 }
 0x193   : > { %2622 = vset.pattern.permute.xlu1 %v2820_v26  ;;  %2324 = vmatmul.msk.f32.gmra.mxu0 %vm1056_vm2, %v2819_v57  ;;  %vm1640_vm10 = vcmp.eq.s32.totalorder %v1606_v40, %v3088_v52 }
 0x194   : > { %2388 = vmatmul.msk.f32.gmra.mxu2 %vm1444_vm3, %v2819_v57  ;;  %1623 = vperm.xlu1 %2622, %v2710_v60  }
 0x195   : > { %2420 = vmatmul.msk.f32.gmra.mxu3 %vm1638_vm1, %v2819_v57 }
 0x197   : > { %v3562_v20 = vpop.f32.mrf.mxu2 }
 0x198   : > { %v3570_v4 = vpop.f32.mrf.mxu1 }
 0x199   : > { %v3566_v0 = vpop.f32.mrf.mxu3 }
 0x19a   : > { %v1409_v17 = vpop.permute.xlu1 %1408  ;;  %2357 = vmatmul.msk.f32.gmra.mxu1 %vm1251_vm4, %v2819_v57  ;;  %2625 = vset.pattern.permute.xlu2 %v2823_v9 }
 0x19b   : > { %vm1445_vm6 = vcmp.eq.s32.totalorder %v1409_v17, %v3088_v52  ;;  %2325 = vmatmul.msk.f32.gmra.mxu0 %vm1057_vm5, %v2819_v57  ;;  %1044 = vperm.xlu2 %2625, %v2711_v41   ;;  %v1415_v16 = vpop.permute.xlu2 %1414 }
 0x19c   : > { %2624 = vset.pattern.permute.xlu1 %v2822_v33  ;;  %2389 = vmatmul.msk.f32.gmra.mxu2 %vm1445_vm6, %v2819_v57  ;;  %vm1447_vm9 = vcmp.eq.s32.totalorder %v1415_v16, %v3088_v52 }
 0x19d   : > { %1432 = vperm.xlu1 %2624, %v2711_v41  }
 0x19f   : > { %v3577_v21 = vpop.f32.mrf.mxu2 }
 0x1a0   : > { %v592_v8 = vpop.f32.mrf.mxu1 }
 0x1a1   : > { %v3581_v36 = vpop.f32.mrf.mxu3  ;;  %v593_v48 = vadd.f32 %v592_v8, %v3427_v31 }
 0x1a3   : > { %v1603_v45 = vpop.permute.xlu1 %1602  ;;  %2628 = vset.pattern.permute.xlu2 %v2822_v33 }
 0x1a4   : > { %vm1639_vm8 = vcmp.eq.s32.totalorder %v1603_v45, %v3088_v52  ;;  %2390 = vmatmul.msk.f32.gmra.mxu2 %vm1446_vm7, %v2819_v57  ;;  %1435 = vperm.xlu2 %2628, %v2712_v3   ;;  %v1221_v43 = vpop.permute.xlu2 %1220 }
 0x1a5   : > { %2627 = vset.pattern.permute.xlu1 %v2821_v54  ;;  %2421 = vmatmul.msk.f32.gmra.mxu3 %vm1639_vm8, %v2819_v57  ;;  %vm1253_vm15 = vcmp.eq.s32.totalorder %v1221_v43, %v3088_v52 }
 0x1a6   : > { %1238 = vperm.xlu1 %2627, %v2711_v41  }
 0x1a7   : > { %v3589_v7 = vpop.f32.mrf.mxu2 }
 0x1a8   : > { %v595_v59 = vpop.f32.mrf.mxu1 }
 0x1a9   : > { %v3594_v53 = vpop.f32.mrf.mxu3 }
 0x1ac   : > { %v1024_v25 = vpop.permute.xlu1 %1023  ;;  %2391 = vmatmul.msk.f32.gmra.mxu2 %vm1447_vm9, %v2819_v57  ;;  %2630 = vset.pattern.permute.xlu2 %v2820_v26 }
 0x1ad   : > { %vm1058_vm11 = vcmp.eq.s32.totalorder %v1024_v25, %v3088_v52  ;;  %2422 = vmatmul.msk.f32.gmra.mxu3 %vm1640_vm10, %v2819_v57  ;;  %1629 = vperm.xlu2 %2630, %v2712_v3   ;;  %v1030_v2 = vpop.permute.xlu2 %1029 }
 0x1ae   : > { %2629 = vset.pattern.permute.xlu1 %v2823_v9  ;;  %2326 = vmatmul.msk.f32.gmra.mxu0 %vm1058_vm11, %v2819_v57  ;;  %vm1060_vm14 = vcmp.eq.s32.totalorder %v1030_v2, %v3088_v52 }
 0x1af   : > { %v3604_v28 = vpop.f32.mrf.mxu2  ;;  %1047 = vperm.xlu1 %2629, %v2712_v3  }
 0x1b0   : > { %v598_v1 = vpop.f32.mrf.mxu1 }
 0x1b1   : > { %v3609_v37 = vpop.f32.mrf.mxu3  ;;  %v599_v43 = vadd.f32 %v598_v1, %v3466_v12 }
 0x1b5   : > { %v1218_v15 = vpop.permute.xlu1 %1217  ;;  %2633 = vset.pattern.permute.xlu2 %v2823_v9  ;;  %v1829_v9 = vld [vmem:[%s4003_s3 + $0x68] sm:$0xff] }
 0x1b6   : > { %vm1252_vm13 = vcmp.eq.s32.totalorder %v1218_v15, %v3088_v52  ;;  %2327 = vmatmul.msk.f32.gmra.mxu0 %vm1059_vm12, %v2819_v57  ;;  %1050 = vperm.xlu2 %2633, %v2713_v49   ;;  %v1421_v60 = vpop.permute.xlu2 %1420 }
 0x1b7   : > { %v770_v14 = vpop.f32.mrf.mxu2  ;;  %2632 = vset.pattern.permute.xlu1 %v2822_v33  ;;  %2358 = vmatmul.msk.f32.gmra.mxu1 %vm1252_vm13, %v2819_v57  ;;  %v596_v33 = vadd.f32 %v595_v59, %v3447_v23  ;;  %v1828_v23 = vld [vmem:[%s4003_s3 + $0x60] sm:$0xff]  ;;  %v1827_v59 = vld [vmem:[%s4003_s3 + $0x58] sm:$0xff]  ;;  %vm1449_vm4 = vcmp.eq.s32.totalorder %v1421_v60, %v3088_v52 }
 0x1b8   : > { %v802_v50 = vadd.f32 %v770_v14, %v593_v48  ;;  %1438 = vperm.xlu1 %2632, %v2713_v49   ;;  %1838 = vmatpush.msra.mxu0 %v1829_v9  ;;  %v601_v8 = vpop.f32.mrf.mxu1 }
 0x1b9   : > { %v964_v31 = vpop.f32.mrf.mxu3  ;;  %v602_v12 = vadd.f32 %v601_v8, %v3485_v22 }
 0x1ba   : > { %v3622_v10 = vadd.f32 %v964_v31, %v802_v50  ;;  %1839 = vmatpush.msra.mxu0 %v1828_v23  ;;  %v1826_v50 = vld [vmem:[%s4003_s3 + $0x50] sm:$0xff] }
 0x1bc   : > { %1840 = vmatpush.msra.mxu0 %v1827_v59 }
 0x1be   : > { %v1609_v40 = vpop.permute.xlu1 %1608  ;;  %2328 = vmatmul.msk.f32.gmra.mxu0 %vm1060_vm14, %v2819_v57  ;;  %2635 = vset.pattern.permute.xlu2 %v2821_v54  ;;  %v1612_v54 = vpop.permute.xlu0 %1611 }
 0x1bf   : > { %vm1641_vm0 = vcmp.eq.s32.totalorder %v1609_v40, %v3088_v52  ;;  %v773_v17 = vpop.f32.mrf.mxu2  ;;  %2359 = vmatmul.msk.f32.gmra.mxu1 %vm1253_vm15, %v2819_v57  ;;  %1244 = vperm.xlu2 %2635, %v2713_v49   ;;  %v1615_v3 = vpop.permute.xlu2 %1614  ;;  %vm1642_vm1 = vcmp.eq.s32.totalorder %v1612_v54, %v3088_v52 }
 0x1c0   : > { %v803_v41 = vadd.f32 %v773_v17, %v596_v33  ;;  %2634 = vset.pattern.permute.xlu1 %v2820_v26  ;;  %2423 = vmatmul.msk.f32.gmra.mxu3 %vm1641_vm0, %v2819_v57  ;;  %v604_v15 = vpop.f32.mrf.mxu1  ;;  %vm1643_vm3 = vcmp.eq.s32.totalorder %v1615_v3, %v3088_v52 }
 0x1c1   : > { %v967_v16 = vpop.f32.mrf.mxu3  ;;  %1632 = vperm.xlu1 %2634, %v2713_v49   ;;  %1841 = vmatpush.msra.mxu0 %v1826_v50  ;;  %v605_v60 = vadd.f32 %v604_v15, %v3425_v55 }
 0x1c2   : > { %v3636_v45 = vadd.f32 %v967_v16, %v803_v41  ;;  %v1825_v41 = vld [vmem:[%s4003_s3 + $0x48] sm:$0xff] }
 0x1c3   : > { %1842 = vmatpush.msra.mxu0 %v1825_v41 }
 0x1c6   : > { %v1227_v22 = vpop.permute.xlu0 %1226 }
 0x1c7   : > { %v776_v56 = vpop.f32.mrf.mxu2  ;;  %v1418_v26 = vpop.permute.xlu1 %1417  ;;  %vm1255_vm6 = vcmp.eq.s32.totalorder %v1227_v22, %v3088_v52 }
 0x1c8   : > { %v804_v25 = vadd.f32 %v776_v56, %v599_v43  ;;  %vm1448_vm2 = vcmp.eq.s32.totalorder %v1418_v26, %v3088_v52  ;;  %2424 = vmatmul.msk.f32.gmra.mxu3 %vm1642_vm1, %v2819_v57  ;;  %v1036_v35 = vpop.permute.xlu2 %1035  ;;  %v607_v33 = vpop.f32.mrf.mxu1  ;;  %v1824_v56 = vld [vmem:[%s4003_s3 + $0x40] sm:$0xff] }
 0x1c9   : > { %v970_v30 = vpop.f32.mrf.mxu3  ;;  %2392 = vmatmul.msk.f32.gmra.mxu2 %vm1448_vm2, %v2819_v57  ;;  %v608_v55 = vadd.f32 %v607_v33, %v3443_v11  ;;  %vm1062_vm9 = vcmp.eq.s32.totalorder %v1036_v35, %v3088_v52  ;;  %1843 = vmatpush.msra.mxu0 %v1824_v56 }
 0x1ca   : > { %v3646_v2 = vadd.f32 %v970_v30, %v804_v25 }
 0x1cf   : > { %v779_v48 = vpop.f32.mrf.mxu2 }
 0x1d0   : > { %v805_v49 = vadd.f32 %v779_v48, %v602_v12  ;;  %v1224_v14 = vpop.permute.xlu1 %1223  ;;  %2425 = vmatmul.msk.f32.gmra.mxu3 %vm1643_vm3, %v2819_v57  ;;  %v610_v26 = vpop.f32.mrf.mxu1  ;;  %v1823_v48 = vld [vmem:[%s4003_s3 + $0x38] sm:$0xff] }
 0x1d1   : > { %vm1254_vm5 = vcmp.eq.s32.totalorder %v1224_v14, %v3088_v52  ;;  %v973_v9 = vpop.f32.mrf.mxu3  ;;  %2393 = vmatmul.msk.f32.gmra.mxu2 %vm1449_vm4, %v2819_v57  ;;  %v1230_v31 = vpop.permute.xlu2 %1229  ;;  %v611_v11 = vadd.f32 %v610_v26, %v3463_v6  ;;  %1844 = vmatpush.msra.mxu0 %v1823_v48  ;;  %v1820_v26 = vld [vmem:[%s4003_s3 + $0x20] sm:$0xff]  ;;  %v1817_v48 = vld [vmem:[%s4003_s3 + $0x8] sm:$0xff] }
 0x1d2   : > { %v3657_v1 = vadd.f32 %v973_v9, %v805_v49  ;;  %2360 = vmatmul.msk.f32.gmra.mxu1 %vm1254_vm5, %v2819_v57  ;;  %vm1256_vm8 = vcmp.eq.s32.totalorder %v1230_v31, %v3088_v52  ;;  %v1427_v12 = vpop.permute.xlu0 %1426  ;;  %v3686_v49 = vpop.f32.mrf.mxu0 }
 0x1d3   : > { %vm1451_vm11 = vcmp.eq.s32.totalorder %v1427_v12, %v3088_v52  ;;  %v1818_v12 = vld [vmem:[%s4003_s3 + $0x10] sm:$0xff] }
 0x1d7   : > { %v782_v40 = vpop.f32.mrf.mxu2 }
 0x1d8   : > { %v806_v17 = vadd.f32 %v782_v40, %v605_v60  ;;  %v613_v22 = vpop.f32.mrf.mxu1  ;;  %v1822_v40 = vld [vmem:[%s4003_s3 + $0x30] sm:$0xff] }
 0x1d9   : > { %v976_v23 = vpop.f32.mrf.mxu3  ;;  %v1033_v16 = vpop.permute.xlu1 %1032  ;;  %v614_v6 = vadd.f32 %v613_v22, %v3479_v34  ;;  %1845 = vmatpush.msra.mxu0 %v1822_v40  ;;  %v1816_v22 = vld [vmem:[%s4003_s3] sm:$0xff] }
 0x1da   : > { %v3665_v54 = vadd.f32 %v976_v23, %v806_v17  ;;  %vm1061_vm7 = vcmp.eq.s32.totalorder %v1033_v16, %v3088_v52  ;;  %2361 = vmatmul.msk.f32.gmra.mxu1 %vm1255_vm6, %v2819_v57  ;;  %v1621_v43 = vpop.permute.xlu2 %1620  ;;  %v506_v23 = vpop.f32.mrf.mxu0 }
 0x1db   : > { %2329 = vmatmul.msk.f32.gmra.mxu0 %vm1061_vm7, %v2819_v57  ;;  %vm1645_vm14 = vcmp.eq.s32.totalorder %v1621_v43, %v3088_v52  ;;  %v1042_v34 = vpop.permute.xlu0 %1041 }
 0x1dc   : > { %vm1064_vm0 = vcmp.eq.s32.totalorder %v1042_v34, %v3088_v52 }
 0x1df   : > { %v785_v3 = vpop.f32.mrf.mxu2 }
 0x1e0   : > { %v807_v8 = vadd.f32 %v785_v3, %v608_v55  ;;  %v1821_v3 = vld [vmem:[%s4003_s3 + $0x28] sm:$0xff] }
 0x1e1   : > { %v979_v25 = vpop.f32.mrf.mxu3  ;;  %1846 = vmatpush.msra.mxu0 %v1821_v3 }
 0x1e2   : > { %v3676_v59 = vadd.f32 %v979_v25, %v807_v8  ;;  %v1424_v30 = vpop.permute.xlu1 %1423  ;;  %2362 = vmatmul.msk.f32.gmra.mxu1 %vm1256_vm8, %v2819_v57  ;;  %v3710_v8 = vpop.f32.mrf.mxu0  ;;  %v1819_v25 = vld [vmem:[%s4003_s3 + $0x18] sm:$0xff] }
 0x1e3   : > { %vm1450_vm10 = vcmp.eq.s32.totalorder %v1424_v30, %v3088_v52  ;;  %2330 = vmatmul.msk.f32.gmra.mxu0 %vm1062_vm9, %v2819_v57  ;;  %v1430_v9 = vpop.permute.xlu2 %1429 }
 0x1e4   : > { %2394 = vmatmul.msk.f32.gmra.mxu2 %vm1450_vm10, %v2819_v57  ;;  %vm1452_vm13 = vcmp.eq.s32.totalorder %v1430_v9, %v3088_v52  ;;  %1847 = vmatpush.msra.mxu0 %v1820_v26  ;;  %v572_v26 = vadd.f32 %v3468_v27, %v506_v23  ;;  %v575_v23 = vadd.f32 %v3489_v32, %v3710_v8 }
 0x1e6   : > { %1848 = vmatpush.msra.mxu0 %v1819_v25 }
 0x1e7   : > { %v788_v35 = vpop.f32.mrf.mxu2 }
 0x1e8   : > { %v808_v15 = vadd.f32 %v788_v35, %v611_v11  ;;  %1849 = vmatpush.msra.mxu0 %v1818_v12 }
 0x1e9   : > { %v982_v14 = vpop.f32.mrf.mxu3 }
 0x1ea   : > { %v3689_v50 = vadd.f32 %v982_v14, %v808_v15  ;;  %v3724_v35 = vpop.f32.mrf.mxu0  ;;  %v1627_v15 = vpop.permute.xlu0 %1626  ;;  %1850 = vmatpush.msra.mxu0 %v1817_v48 }
 0x1eb   : > { %v1618_v60 = vpop.permute.xlu1 %1617  ;;  %vm1647_vm5 = vcmp.eq.s32.totalorder %v1627_v15, %v3088_v52 }
 0x1ec   : > { %vm1644_vm12 = vcmp.eq.s32.totalorder %v1618_v60, %v3088_v52  ;;  %2395 = vmatmul.msk.f32.gmra.mxu2 %vm1451_vm11, %v2819_v57  ;;  %v1236_v55 = vpop.permute.xlu2 %1235  ;;  %1851 = vmatpush.msra.mxu0 %v1816_v22 }
 0x1ed   : > { %2426 = vmatmul.msk.f32.gmra.mxu3 %vm1644_vm12, %v2819_v57  ;;  %vm1258_vm3 = vcmp.eq.s32.totalorder %v1236_v55, %v3088_v52 }
 0x1ef   : > { %v791_v31 = vpop.f32.mrf.mxu2 }
 0x1f0   : > { %v809_v33 = vadd.f32 %v791_v31, %v614_v6  ;;  %v1328_v6 = vpop.f32.mrf.mxu1 }
 0x1f1   : > { %v985_v17 = vpop.f32.mrf.mxu3 }
 0x1f2   : > { %v3700_v41 = vadd.f32 %v985_v17, %v809_v33  ;;  %v1134_v14 = vpop.f32.mrf.mxu0  ;;  %v569_v17 = vadd.f32 %v3449_v42, %v3686_v49  ;;  %v1242_v34 = vpop.permute.xlu0 %1241 }
 0x1f3   : > { %vm1260_vm10 = vcmp.eq.s32.totalorder %v1242_v34, %v3088_v52 }
 0x1f4   : > { %v1039_v16 = vpop.permute.xlu1 %1038  ;;  %2396 = vmatmul.msk.f32.gmra.mxu2 %vm1452_vm13, %v2819_v57  ;;  %v794_v55 = vadd.f32 %v3502_v39, %v569_v17 }
 0x1f5   : > { %vm1063_vm15 = vcmp.eq.s32.totalorder %v1039_v16, %v3088_v52  ;;  %2427 = vmatmul.msk.f32.gmra.mxu3 %vm1645_vm14, %v2819_v57  ;;  %v1045_v56 = vpop.permute.xlu2 %1044 }
 0x1f6   : > { %2331 = vmatmul.msk.f32.gmra.mxu0 %vm1063_vm15, %v2819_v57  ;;  %vm1065_vm2 = vcmp.eq.s32.totalorder %v1045_v56, %v3088_v52 }
 0x1f7   : > { %v1522_v33 = vpop.f32.mrf.mxu2 }
 0x1f8   : > { %v1331_v56 = vpop.f32.mrf.mxu1 }
 0x1f9   : > { %v1716_v3 = vpop.f32.mrf.mxu3 }
 0x1fa   : > { %v1137_v31 = vpop.f32.mrf.mxu0 }
 0x1fd   : > { %v1233_v43 = vpop.permute.xlu1 %1232 }
 0x1fe   : > { %vm1257_vm1 = vcmp.eq.s32.totalorder %v1233_v43, %v3088_v52  ;;  %2332 = vmatmul.msk.f32.gmra.mxu0 %vm1064_vm0, %v2819_v57  ;;  %v1436_v11 = vpop.permute.xlu2 %1435  ;;  %v988_v43 = vadd.f32 %v3499_v38, %v794_v55 }
 0x1ff   : > { %2363 = vmatmul.msk.f32.gmra.mxu1 %vm1257_vm1, %v2819_v57  ;;  %vm1454_vm8 = vcmp.eq.s32.totalorder %v1436_v11, %v3088_v52  ;;  %v795_v11 = vadd.f32 %v3514_v44, %v572_v26  ;;  %v3766_v44 = vld [vmem:[%s4002_s2] ss:$0 sm:$0xff] }
 0x200   : > { %v1182_v25 = vadd.f32 %v1134_v14, %v988_v43 }
 0x201   : > { %v989_v12 = vadd.f32 %v3519_v63, %v795_v11  ;;  %v1719_v27 = vpop.f32.mrf.mxu3  ;;  %v796_v63 = vadd.f32 %v3528_v24, %v575_v23 }
 0x202   : > { %v1140_v49 = vpop.f32.mrf.mxu0  ;;  %v1376_v39 = vadd.f32 %v1328_v6, %v1182_v25 }
 0x203   : > { %v1183_v48 = vadd.f32 %v1137_v31, %v989_v12 }
 0x204   : > { %v1570_v38 = vadd.f32 %v1522_v33, %v1376_v39  ;;  %v990_v33 = vadd.f32 %v3534_v58, %v796_v63 }
 0x206   : > { %v1624_v30 = vpop.permute.xlu1 %1623  ;;  %2333 = vmatmul.msk.f32.gmra.mxu0 %vm1065_vm2, %v2819_v57  ;;  %v1764_v14 = vadd.f32 %v1716_v3, %v1570_v38  ;;  %v1184_v17 = vadd.f32 %v1140_v49, %v990_v33 }
 0x207   : > { %vm1646_vm4 = vcmp.eq.s32.totalorder %v1624_v30, %v3088_v52  ;;  %2364 = vmatmul.msk.f32.gmra.mxu1 %vm1258_vm3, %v2819_v57  ;;  %v1630_v60 = vpop.permute.xlu2 %1629  ;;  %v1525_v30 = vpop.f32.mrf.mxu2 }
 0x208   : > { %2428 = vmatmul.msk.f32.gmra.mxu3 %vm1646_vm4, %v2819_v57  ;;  %vm1648_vm7 = vcmp.eq.s32.totalorder %v1630_v60, %v3088_v52  ;;  %v1377_v60 = vadd.f32 %v1331_v56, %v1183_v48  ;;  %v1784_v8 = vadd.f32 %v3766_v44, %v1764_v14 }
 0x209   : > { %v1722_v34 = vpop.f32.mrf.mxu3 }
 0x20a   : > { %v1143_v6 = vpop.f32.mrf.mxu0  ;;  %v1571_v31 = vadd.f32 %v1525_v30, %v1377_v60 }
 0x20c   : > { %v1765_v24 = vadd.f32 %v1719_v27, %v1571_v31 }
 0x20e   : > { %v1785_v58 = vadd.f32 %v3766_v44, %v1765_v24 }
 0x20f   : > { %v1433_v9 = vpop.permute.xlu1 %1432  ;;  %v1528_v32 = vpop.f32.mrf.mxu2 }
 0x210   : > { %vm1453_vm6 = vcmp.eq.s32.totalorder %v1433_v9, %v3088_v52  ;;  %2429 = vmatmul.msk.f32.gmra.mxu3 %vm1647_vm5, %v2819_v57  ;;  %v1051_v16 = vpop.permute.xlu2 %1050  ;;  %v1334_v9 = vpop.f32.mrf.mxu1  ;;  %v1801_v11 = vmax.f32 %v1785_v58, 0.0 }
 0x211   : > { %2397 = vmatmul.msk.f32.gmra.mxu2 %vm1453_vm6, %v2819_v57  ;;  %vm1067_vm13 = vcmp.eq.s32.totalorder %v1051_v16, %v3088_v52  ;;  %v1800_v16 = vmax.f32 %v1784_v8, 0.0  ;;  %v1378_v43 = vadd.f32 %v1334_v9, %v1184_v17 }
 0x212   : > { %v1146_v26 = vpop.f32.mrf.mxu0 }
 0x213   : > { %v1572_v25 = vadd.f32 %v1528_v32, %v1378_v43 }
 0x215   : > { %v1766_v30 = vadd.f32 %v1722_v34, %v1572_v25 }
 0x217   : > { %v1786_v12 = vadd.f32 %v3766_v44, %v1766_v30 }
 0x218   : > { %v1239_v40 = vpop.permute.xlu1 %1238  ;;  %2430 = vmatmul.msk.f32.gmra.mxu3 %vm1648_vm7, %v2819_v57  ;;  %v1337_v55 = vpop.f32.mrf.mxu1 }
 0x219   : > { %vm1259_vm9 = vcmp.eq.s32.totalorder %v1239_v40, %v3088_v52  ;;  %2398 = vmatmul.msk.f32.gmra.mxu2 %vm1454_vm8, %v2819_v57  ;;  %v1245_v15 = vpop.permute.xlu2 %1244  ;;  %v578_v40 = vadd.f32 %v3506_v47, %v3724_v35  ;;  %v581_v47 = vadd.f32 %v3517_v5, %v3366_v19  ;;  %v584_v19 = vadd.f32 %v3530_v51, %v3386_v18 }
 0x21a   : > { %2365 = vmatmul.msk.f32.gmra.mxu1 %vm1259_vm9, %v2819_v57  ;;  %vm1261_vm12 = vcmp.eq.s32.totalorder %v1245_v15, %v3088_v52  ;;  %v1149_v27 = vpop.f32.mrf.mxu0 }
 0x21b   : > { %v797_v3 = vadd.f32 %v3546_v29, %v578_v40  ;;  %v798_v49 = vadd.f32 %v3562_v20, %v581_v47  ;;  %v799_v20 = vadd.f32 %v3577_v21, %v584_v19 }
 0x21d   : > { %v991_v35 = vadd.f32 %v3550_v61, %v797_v3  ;;  %v992_v38 = vadd.f32 %v3566_v0, %v798_v49  ;;  %v1802_v61 = vmax.f32 %v1786_v12, 0.0  ;;  %v993_v32 = vadd.f32 %v3581_v36, %v799_v20 }
 0x21f   : > { %v1185_v29 = vadd.f32 %v1143_v6, %v991_v35  ;;  %v1186_v23 = vadd.f32 %v1146_v26, %v992_v38  ;;  %v587_v6 = vadd.f32 %v3548_v62, %v3405_v13  ;;  %v1187_v18 = vadd.f32 %v1149_v27, %v993_v32 }
 0x220   : > { %v1340_v39 = vpop.f32.mrf.mxu1  ;;  %v590_v13 = vadd.f32 %v3570_v4, %v3429_v46 }
 0x221   : > { %v1048_v42 = vpop.permute.xlu1 %1047  ;;  %v1379_v15 = vadd.f32 %v1337_v55, %v1185_v29  ;;  %v1380_v14 = vadd.f32 %v1340_v39, %v1186_v23  ;;  %v800_v8 = vadd.f32 %v3589_v7, %v587_v6 }
 0x222   : > { %vm1066_vm11 = vcmp.eq.s32.totalorder %v1048_v42, %v3088_v52  ;;  %2366 = vmatmul.msk.f32.gmra.mxu1 %vm1260_vm10, %v2819_v57  ;;  %v1531_v42 = vpop.f32.mrf.mxu2 }
 0x223   : > { %2334 = vmatmul.msk.f32.gmra.mxu0 %vm1066_vm11, %v2819_v57  ;;  %v994_v40 = vadd.f32 %v3594_v53, %v800_v8 }
 0x228   : > { %v1343_v9 = vpop.f32.mrf.mxu1 }
 0x22a   : > { %v1439_v22 = vpop.permute.xlu1 %1438  ;;  %2367 = vmatmul.msk.f32.gmra.mxu1 %vm1261_vm12, %v2819_v57  ;;  %v1534_v48 = vpop.f32.mrf.mxu2 }
 0x22b   : > { %vm1455_vm14 = vcmp.eq.s32.totalorder %v1439_v22, %v3088_v52  ;;  %2335 = vmatmul.msk.f32.gmra.mxu0 %vm1067_vm13, %v2819_v57  ;;  %v1574_v22 = vadd.f32 %v1534_v48, %v1380_v14  ;;  %v1152_v60 = vpop.f32.mrf.mxu0 }
 0x22c   : > { %2399 = vmatmul.msk.f32.gmra.mxu2 %vm1455_vm14, %v2819_v57  ;;  %v1188_v34 = vadd.f32 %v1152_v60, %v994_v40 }
 0x232   : > { %v1537_v33 = vpop.f32.mrf.mxu2 }
 0x233   : > { %v1633_v56 = vpop.permute.xlu1 %1632  ;;  %1852 = vmatmul.f32.vlgmr.msra.gmra.mxu0 %v1800_v16  ;;  %v1381_v16 = vadd.f32 %v1343_v9, %v1187_v18  ;;  %v1155_v3 = vpop.f32.mrf.mxu0 }
 0x234   : > { %vm1649_vm15 = vcmp.eq.s32.totalorder %v1633_v56, %v3088_v52  ;;  %v1725_v52 = vpop.f32.mrf.mxu3  ;;  %v1346_v21 = vpop.f32.mrf.mxu1  ;;  %v801_v56 = vadd.f32 %v3604_v28, %v590_v13 }
 0x235   : > { %2431 = vmatmul.msk.f32.gmra.mxu3 %vm1649_vm15, %v2819_v57  ;;  %v1573_v57 = vadd.f32 %v1531_v42, %v1379_v15  ;;  %v1575_v55 = vadd.f32 %v1537_v33, %v1381_v16  ;;  %v1382_v7 = vadd.f32 %v1346_v21, %v1188_v34 }
 0x236   : > { %v995_v42 = vadd.f32 %v3609_v37, %v801_v56 }
 0x237   : > { %v1767_v5 = vadd.f32 %v1725_v52, %v1573_v57 }
 0x238   : > { %v1189_v35 = vadd.f32 %v1155_v3, %v995_v42 }
 0x239   : > { %v1787_v63 = vadd.f32 %v3766_v44, %v1767_v5 }
 0x23a   : > { %v1540_v43 = vpop.f32.mrf.mxu2 }
 0x23b   : > { %1855 = vmatmul.f32.gmra.mxu0 %v1801_v11  ;;  %v1803_v31 = vmax.f32 %v1787_v63, 0.0  ;;  %v1576_v53 = vadd.f32 %v1540_v43, %v1382_v7  ;;  %v1158_v29 = vpop.f32.mrf.mxu0 }
 0x23c   : > { %v1728_v0 = vpop.f32.mrf.mxu3  ;;  %v1349_v58 = vpop.f32.mrf.mxu1  ;;  %v1190_v28 = vadd.f32 %v1158_v29, %v3622_v10 }
 0x23d   : > { %v1768_v51 = vadd.f32 %v1728_v0, %v1574_v22  ;;  %v1383_v30 = vadd.f32 %v1349_v58, %v1189_v35 }
 0x23f   : > { %v1788_v17 = vadd.f32 %v3766_v44, %v1768_v51 }
 0x241   : > { %v1804_v62 = vmax.f32 %v1788_v17, 0.0 }
 0x242   : > { %v1543_v46 = vpop.f32.mrf.mxu2 }
 0x243   : > { %1858 = vmatmul.f32.gmra.mxu0 %v1802_v61  ;;  %v1577_v15 = vadd.f32 %v1543_v46, %v1383_v30 }
 0x244   : > { %v1731_v24 = vpop.f32.mrf.mxu3 }
 0x245   : > { %v1769_v36 = vadd.f32 %v1731_v24, %v1575_v55 }
 0x247   : > { %v1789_v26 = vadd.f32 %v3766_v44, %v1769_v36 }
 0x249   : > { %v1805_v47 = vmax.f32 %v1789_v26, 0.0 }
 0x24b   : > { %1861 = vmatmul.f32.gmra.mxu0 %v1803_v31 }
 0x24c   : > { %v1734_v25 = vpop.f32.mrf.mxu3  ;;  %v1546_v37 = vpop.f32.mrf.mxu2 }
 0x24d   : > { %v1770_v49 = vadd.f32 %v1734_v25, %v1576_v53 }
 0x24f   : > { %v1790_v4 = vadd.f32 %v3766_v44, %v1770_v49  ;;  %v1352_v39 = vpop.f32.mrf.mxu1 }
 0x250   : > { %v1384_v38 = vadd.f32 %v1352_v39, %v1190_v28 }
 0x251   : > { %v1806_v57 = vmax.f32 %v1790_v4, 0.0 }
 0x252   : > { %v1578_v23 = vadd.f32 %v1546_v37, %v1384_v38 }
 0x253   : > { %1864 = vmatmul.f32.gmra.mxu0 %v1804_v62 }
 0x254   : > { %v1737_v11 = vpop.f32.mrf.mxu3  ;;  %v1549_v9 = vpop.f32.mrf.mxu2 }
 0x255   : > { %v1771_v52 = vadd.f32 %v1737_v11, %v1577_v15 }
 0x257   : > { %v1791_v27 = vadd.f32 %v3766_v44, %v1771_v52  ;;  %v1355_v5 = vpop.f32.mrf.mxu1 }
 0x258   : > { %v1161_v12 = vpop.f32.mrf.mxu0 }
 0x259   : > { %v1191_v48 = vadd.f32 %v1161_v12, %v3636_v45  ;;  %v1807_v61 = vmax.f32 %v1791_v27, 0.0 }
 0x25b   : > { %1867 = vmatmul.f32.gmra.mxu0 %v1805_v47  ;;  %v1385_v14 = vadd.f32 %v1355_v5, %v1191_v48 }
 0x25c   : > { %v1740_v19 = vpop.f32.mrf.mxu3 }
 0x25d   : > { %v1772_v20 = vadd.f32 %v1740_v19, %v1578_v23  ;;  %v1579_v22 = vadd.f32 %v1549_v9, %v1385_v14 }
 0x25f   : > { %v1792_v10 = vadd.f32 %v3766_v44, %v1772_v20  ;;  %v1358_v8 = vpop.f32.mrf.mxu1  ;;  %v3821_v20 = vld [vmem:[%s4004_s4] ss:$0 sm:$0xff] }
 0x260   : > { %v1164_v0 = vpop.f32.mrf.mxu0 }
 0x261   : > { %v1808_v60 = vmax.f32 %v1792_v10, 0.0  ;;  %v1192_v32 = vadd.f32 %v1164_v0, %v3646_v2 }
 0x263   : > { %1870 = vmatmul.f32.gmra.mxu0 %v1806_v57  ;;  %v1386_v51 = vadd.f32 %v1358_v8, %v1192_v32 }
 0x264   : > { %v1743_v63 = vpop.f32.mrf.mxu3 }
 0x265   : > { %v1773_v6 = vadd.f32 %v1743_v63, %v1579_v22 }
 0x267   : > { %v1552_v18 = vpop.f32.mrf.mxu2  ;;  %v1793_v45 = vadd.f32 %v3766_v44, %v1773_v6 }
 0x268   : > { %v1580_v33 = vadd.f32 %v1552_v18, %v1386_v51 }
 0x269   : > { %v1809_v40 = vmax.f32 %v1793_v45, 0.0 }
 0x26b   : > { %1873 = vmatmul.f32.gmra.mxu0 %v1807_v61 }
 0x26f   : > { %v1555_v3 = vpop.f32.mrf.mxu2 }
 0x270   : > { %v1746_v31 = vpop.f32.mrf.mxu3 }
 0x271   : > { %v1774_v17 = vadd.f32 %v1746_v31, %v1580_v33 }
 0x273   : > { %1876 = vmatmul.f32.gmra.mxu0 %v1808_v60  ;;  %v1167_v21 = vpop.f32.mrf.mxu0  ;;  %v1794_v55 = vadd.f32 %v3766_v44, %v1774_v17 }
 0x274   : > { %v1193_v16 = vadd.f32 %v1167_v21, %v3657_v1 }
 0x275   : > { %v1810_v62 = vmax.f32 %v1794_v55, 0.0 }
 0x277   : > { %v1558_v25 = vpop.f32.mrf.mxu2 }
 0x278   : > { %v1749_v13 = vpop.f32.mrf.mxu3 }
 0x27b   : > { %1879 = vmatmul.f32.gmra.mxu0 %v1809_v40  ;;  %v1170_v36 = vpop.f32.mrf.mxu0 }
 0x27c   : > { %v1361_v24 = vpop.f32.mrf.mxu1  ;;  %v1194_v43 = vadd.f32 %v1170_v36, %v3665_v54 }
 0x27d   : > { %v1387_v34 = vadd.f32 %v1361_v24, %v1193_v16 }
 0x27f   : > { %v1581_v2 = vadd.f32 %v1555_v3, %v1387_v34 }
 0x281   : > { %v1775_v7 = vadd.f32 %v1749_v13, %v1581_v2 }
 0x283   : > { %1882 = vmatmul.f32.gmra.mxu0 %v1810_v62  ;;  %v1795_v26 = vadd.f32 %v3766_v44, %v1775_v7  ;;  %v1173_v29 = vpop.f32.mrf.mxu0 }
 0x284   : > { %v1364_v56 = vpop.f32.mrf.mxu1  ;;  %v1195_v30 = vadd.f32 %v1173_v29, %v3676_v59 }
 0x285   : > { %v1388_v53 = vadd.f32 %v1364_v56, %v1194_v43  ;;  %v1811_v1 = vmax.f32 %v1795_v26, 0.0 }
 0x287   : > { %v1582_v58 = vadd.f32 %v1558_v25, %v1388_v53 }
 0x28b   : > { %v1752_v42 = vpop.f32.mrf.mxu3  ;;  %1885 = vmatmul.f32.gmra.mxu0 %v1811_v1 }
 0x28c   : > { %v1776_v47 = vadd.f32 %v1752_v42, %v1582_v58 }
 0x28e   : > { %v1796_v35 = vadd.f32 %v3766_v44, %v1776_v47 }
 0x290   : > { %v1812_v49 = vmax.f32 %v1796_v35, 0.0 }
 0x293   : > { %1888 = vmatmul.f32.gmra.mxu0 %v1812_v49  ;;  %v1755_v11 = vpop.f32.mrf.mxu3 }
 0x294   : > { %v1561_v54 = vpop.f32.mrf.mxu2 }
 0x297   : > { %v1367_v46 = vpop.f32.mrf.mxu1 }
 0x298   : > { %v1389_v4 = vadd.f32 %v1367_v46, %v1195_v30 }
 0x29a   : > { %v1583_v39 = vadd.f32 %v1561_v54, %v1389_v4 }
 0x29b   : > { %v1758_v23 = vpop.f32.mrf.mxu3 }
 0x29c   : > { %v1777_v28 = vadd.f32 %v1755_v11, %v1583_v39  ;;  %v1564_v27 = vpop.f32.mrf.mxu2 }
 0x29e   : > { %v1797_v15 = vadd.f32 %v3766_v44, %v1777_v28 }
 0x29f   : > { %v1370_v57 = vpop.f32.mrf.mxu1 }
 0x2a0   : > { %v1813_v52 = vmax.f32 %v1797_v15, 0.0  ;;  %v1176_v38 = vpop.f32.mrf.mxu0 }
 0x2a1   : > { %v1196_v12 = vadd.f32 %v1176_v38, %v3689_v50 }
 0x2a2   : > { %1891 = vmatmul.f32.gmra.mxu0 %v1813_v52 }
 0x2a3   : > { %v1390_v37 = vadd.f32 %v1370_v57, %v1196_v12 }
 0x2a5   : > { %v1584_v48 = vadd.f32 %v1564_v27, %v1390_v37 }
 0x2a7   : > { %v1778_v19 = vadd.f32 %v1758_v23, %v1584_v48  ;;  %v1373_v10 = vpop.f32.mrf.mxu1 }
 0x2a8   : > { %v1179_v59 = vpop.f32.mrf.mxu0 }
 0x2a9   : > { %v1798_v5 = vadd.f32 %v3766_v44, %v1778_v19  ;;  %v1197_v9 = vadd.f32 %v1179_v59, %v3700_v41 }
 0x2ab   : > { %v1814_v61 = vmax.f32 %v1798_v5, 0.0  ;;  %v1391_v63 = vadd.f32 %v1373_v10, %v1197_v9 }
 0x2ad   : > { %1894 = vmatmul.f32.gmra.mxu0 %v1814_v61 }
 0x2af   : > { %v1567_v22 = vpop.f32.mrf.mxu2 }
 0x2b0   : > { %v1853_v14 = vpop.f32.mrf.mxu0  ;;  %v1585_v0 = vadd.f32 %v1567_v22, %v1391_v63 }
 0x2b1   : > { %v1854_v50 = vadd.f32 %v3821_v20, %v1853_v14 }
 0x2b3   : > { %1901 = vmax.xlane.f32.xlu0 %v1854_v50 }
 0x2b8   : > { %v1761_v60 = vpop.f32.mrf.mxu3  ;;  %v1856_v6 = vpop.f32.mrf.mxu0 }
 0x2b9   : > { %v1779_v32 = vadd.f32 %v1761_v60, %v1585_v0  ;;  %v1857_v8 = vadd.f32 %v3821_v20, %v1856_v6 }
 0x2bb   : > { %v1799_v18 = vadd.f32 %v3766_v44, %v1779_v32  ;;  %1903 = vmax.xlane.f32.xlu1 %v1857_v8 }
 0x2bd   : > { %v1815_v45 = vmax.f32 %v1799_v18, 0.0 }
 0x2bf   : > { %1897 = vmatmul.f32.gmra.mxu0 %v1815_v45 }
 0x2c0   : > { %v1859_v51 = vpop.f32.mrf.mxu0 }
 0x2c1   : > { %v1860_v41 = vadd.f32 %v3821_v20, %v1859_v51 }
 0x2c3   : > { %1905 = vmax.xlane.f32.xlu2 %v1860_v41 }
 0x2c8   : > { %v1862_v31 = vpop.f32.mrf.mxu0 }
 0x2c9   : > { %v1863_v33 = vadd.f32 %v3821_v20, %v1862_v31 }
 0x2cb   : > { %1907 = vmax.xlane.f32.xlu2 %v1863_v33 }
 0x2d0   : > { %v1865_v21 = vpop.f32.mrf.mxu0 }
 0x2d1   : > { %v1866_v40 = vadd.f32 %v3821_v20, %v1865_v21 }
 0x2d3   : > { %1909 = vmax.xlane.f32.xlu0 %v1866_v40 }
 0x2d8   : > { %v1868_v17 = vpop.f32.mrf.mxu0 }
 0x2d9   : > { %v1869_v16 = vadd.f32 %v3821_v20, %v1868_v17 }
 0x2db   : > { %1911 = vmax.xlane.f32.xlu1 %v1869_v16 }
 0x2e0   : > { %v1871_v44 = vpop.f32.mrf.mxu0 }
 0x2e1   : > { %v3832_v24 = vadd.f32 %v3821_v20, %v1871_v44 }
 0x2e3   : > { %1913 = vmax.xlane.f32.xlu2 %v3832_v24 }
 0x2e8   : > { %v1874_v55 = vpop.f32.mrf.mxu0 }
 0x2e9   : > { %v3836_v34 = vadd.f32 %v3821_v20, %v1874_v55 }
 0x2eb   : > { %1915 = vmax.xlane.f32.xlu0 %v3836_v34 }
 0x2f0   : > { %v1877_v3 = vpop.f32.mrf.mxu0 }
 0x2f1   : > { %v3840_v2 = vadd.f32 %v3821_v20, %v1877_v3 }
 0x2f3   : > { %1917 = vmax.xlane.f32.xlu1 %v3840_v2 }
 0x2f8   : > { %v1880_v13 = vpop.f32.mrf.mxu0 }
 0x2f9   : > { %v3844_v62 = vadd.f32 %v3821_v20, %v1880_v13 }
 0x2fb   : > { %1919 = vmax.xlane.f32.xlu2 %v3844_v62 }
 0x300   : > { %v1883_v36 = vpop.f32.mrf.mxu0 }
 0x301   : > { %v3848_v7 = vadd.f32 %v3821_v20, %v1883_v36 }
 0x303   : > { %1921 = vmax.xlane.f32.xlu0 %v3848_v7 }
 0x308   : > { %v1886_v43 = vpop.f32.mrf.mxu0 }
 0x309   : > { %v3852_v56 = vadd.f32 %v3821_v20, %v1886_v43 }
 0x30b   : > { %1923 = vmax.xlane.f32.xlu1 %v3852_v56 }
 0x310   : > { %v1889_v26 = vpop.f32.mrf.mxu0 }
 0x311   : > { %v3856_v53 = vadd.f32 %v3821_v20, %v1889_v26 }
 0x313   : > { %1925 = vmax.xlane.f32.xlu2 %v3856_v53 }
 0x31f   : > { %v1892_v25 = vpop.f32.mrf.mxu0 }
 0x320   : > { %v3860_v1 = vadd.f32 %v3821_v20, %v1892_v25 }
 0x322   : > { %1927 = vmax.xlane.f32.xlu0 %v3860_v1 }
 0x326   : > { %v1902_v58 = vpop.xlane.xlu0 %1901 }
 0x327   : > { %v3863_v42 = vsub.f32 %v1854_v50, %v1902_v58 }
 0x329   : > { %v1949_v47 = vmul.f32 1.442695, %v3863_v42 }
 0x32a   : > { %v1895_v35 = vpop.f32.mrf.mxu0 }
 0x32b   : > { %2639 = vpow2.f32 %v1949_v47  ;;  %v3867_v49 = vadd.f32 %v3821_v20, %v1895_v35 }
 0x32d   : > { %1929 = vmax.xlane.f32.xlu1 %v3867_v49 }
 0x32e   : > { %v1904_v29 = vpop.xlane.xlu1 %1903 }
 0x32f   : > { %v3870_v30 = vsub.f32 %v1857_v8, %v1904_v29 }
 0x331   : > { %v2640_v46 = vpop.eup %2639  ;;  %v1951_v4 = vmul.f32 1.442695, %v3870_v30 }
 0x332   : > { %1981 = vadd.xlane.f32.xlu0 %v2640_v46 }
 0x333   : > { %2641 = vpow2.f32 %v1951_v4 }
 0x336   : > { %v1906_v54 = vpop.xlane.xlu2 %1905 }
 0x337   : > { %v3873_v11 = vsub.f32 %v1860_v41, %v1906_v54 }
 0x339   : > { %v2642_v39 = vpop.eup %2641  ;;  %v1953_v28 = vmul.f32 1.442695, %v3873_v11 }
 0x33a   : > { %1983 = vadd.xlane.f32.xlu1 %v2642_v39 }
 0x33b   : > { %2643 = vpow2.f32 %v1953_v28 }
 0x33c   : > { %v1898_v15 = vpop.f32.mrf.mxu0 }
 0x33d   : > { %v3877_v52 = vadd.f32 %v3821_v20, %v1898_v15 }
 0x33e   : > { %v1908_v38 = vpop.xlane.xlu2 %1907 }
 0x33f   : > { %v3879_v57 = vsub.f32 %v1863_v33, %v1908_v38  ;;  %1931 = vmax.xlane.f32.xlu2 %v3877_v52 }
 0x341   : > { %v1955_v12 = vmul.f32 1.442695, %v3879_v57  ;;  %v2644_v37 = vpop.eup %2643 }
 0x343   : > { %2645 = vpow2.f32 %v1955_v12 }
 0x346   : > { %v1910_v27 = vpop.xlane.xlu0 %1909 }
 0x347   : > { %v3883_v23 = vsub.f32 %v1866_v40, %v1910_v27  ;;  %1985 = vadd.xlane.f32.xlu2 %v2644_v37 }
 0x349   : > { %v2646_v48 = vpop.eup %2645  ;;  %v1957_v19 = vmul.f32 1.442695, %v3883_v23 }
 0x34a   : > { %1987 = vadd.xlane.f32.xlu0 %v2646_v48 }
 0x34b   : > { %2647 = vpow2.f32 %v1957_v19 }
 0x34e   : > { %v1912_v59 = vpop.xlane.xlu1 %1911 }
 0x34f   : > { %v3886_v5 = vsub.f32 %v1869_v16, %v1912_v59 }
 0x351   : > { %v2648_v61 = vpop.eup %2647  ;;  %v1959_v20 = vmul.f32 1.442695, %v3886_v5 }
 0x352   : > { %1989 = vadd.xlane.f32.xlu1 %v2648_v61 }
 0x353   : > { %2649 = vpow2.f32 %v1959_v20 }
 0x356   : > { %v1914_v14 = vpop.xlane.xlu2 %1913 }
 0x357   : > { %v3890_v9 = vsub.f32 %v3832_v24, %v1914_v14 }
 0x359   : > { %v2650_v50 = vpop.eup %2649  ;;  %v1961_v10 = vmul.f32 1.442695, %v3890_v9 }
 0x35a   : > { %1991 = vadd.xlane.f32.xlu2 %v2650_v50 }
 0x35b   : > { %2651 = vpow2.f32 %v1961_v10 }
 0x35e   : > { %v1916_v22 = vpop.xlane.xlu0 %1915 }
 0x35f   : > { %v3894_v63 = vsub.f32 %v3836_v34, %v1916_v22 }
 0x361   : > { %v2652_v0 = vpop.eup %2651  ;;  %v1963_v60 = vmul.f32 1.442695, %v3894_v63 }
 0x362   : > { %1993 = vadd.xlane.f32.xlu0 %v2652_v0 }
 0x363   : > { %2653 = vpow2.f32 %v1963_v60 }
 0x366   : > { %v1918_v6 = vpop.xlane.xlu1 %1917 }
 0x367   : > { %v3898_v32 = vsub.f32 %v3840_v2, %v1918_v6 }
 0x369   : > { %v2654_v8 = vpop.eup %2653  ;;  %v1965_v18 = vmul.f32 1.442695, %v3898_v32 }
 0x36a   : > { %1995 = vadd.xlane.f32.xlu1 %v2654_v8 }
 0x36b   : > { %2655 = vpow2.f32 %v1965_v18 }
 0x36e   : > { %v1920_v45 = vpop.xlane.xlu2 %1919 }
 0x36f   : > { %v3902_v51 = vsub.f32 %v3844_v62, %v1920_v45 }
 0x371   : > { %v2656_v41 = vpop.eup %2655  ;;  %v1967_v31 = vmul.f32 1.442695, %v3902_v51 }
 0x372   : > { %1997 = vadd.xlane.f32.xlu2 %v2656_v41 }
 0x373   : > { %2657 = vpow2.f32 %v1967_v31 }
 0x376   : > { %v1922_v33 = vpop.xlane.xlu0 %1921 }
 0x377   : > { %v3906_v21 = vsub.f32 %v3848_v7, %v1922_v33 }
 0x379   : > { %v2658_v40 = vpop.eup %2657  ;;  %v1969_v17 = vmul.f32 1.442695, %v3906_v21 }
 0x37a   : > { %1999 = vadd.xlane.f32.xlu0 %v2658_v40 }
 0x37b   : > { %2659 = vpow2.f32 %v1969_v17 }
 0x37e   : > { %v1924_v16 = vpop.xlane.xlu1 %1923 }
 0x37f   : > { %v3910_v44 = vsub.f32 %v3852_v56, %v1924_v16 }
 0x381   : > { %v2660_v24 = vpop.eup %2659  ;;  %v1971_v55 = vmul.f32 1.442695, %v3910_v44 }
 0x382   : > { %2001 = vadd.xlane.f32.xlu1 %v2660_v24 }
 0x383   : > { %2661 = vpow2.f32 %v1971_v55 }
 0x386   : > { %v1926_v34 = vpop.xlane.xlu2 %1925 }
 0x387   : > { %v3914_v3 = vsub.f32 %v3856_v53, %v1926_v34 }
 0x389   : > { %v2662_v2 = vpop.eup %2661  ;;  %v1973_v13 = vmul.f32 1.442695, %v3914_v3 }
 0x38a   : > { %2003 = vadd.xlane.f32.xlu2 %v2662_v2 }
 0x38b   : > { %2663 = vpow2.f32 %v1973_v13 }
 0x391   : > { %v2664_v62 = vpop.eup %2663 }
 0x392   : > { %2005 = vadd.xlane.f32.xlu0 %v2664_v62 }
 0x395   : > { %v1928_v36 = vpop.xlane.xlu0 %1927 }
 0x396   : > { %v3918_v7 = vsub.f32 %v3860_v1, %v1928_v36 }
 0x398   : > { %v1975_v43 = vmul.f32 1.442695, %v3918_v7 }
 0x39a   : > { %2665 = vpow2.f32 %v1975_v43 }
 0x3a0   : > { %v2666_v56 = vpop.eup %2665  ;;  %v1930_v26 = vpop.xlane.xlu1 %1929 }
 0x3a1   : > { %v3922_v53 = vsub.f32 %v3867_v49, %v1930_v26  ;;  %2007 = vadd.xlane.f32.xlu1 %v2666_v56 }
 0x3a3   : > { %v1977_v25 = vmul.f32 1.442695, %v3922_v53 }
 0x3a5   : > { %2667 = vpow2.f32 %v1977_v25  ;;  %v1982_v58 = vpop.xlane.xlu0 %1981 }
 0x3a6   : > { %2669 = vlog2.f32 %v1982_v58 }
 0x3ab   : > { %v2668_v47 = vpop.eup %2667 }
 0x3ac   : > { %v2670_v1 = vpop.eup %2669  ;;  %2009 = vadd.xlane.f32.xlu2 %v2668_v47 }
 0x3ad   : > { %v2014_v35 = vmul.f32 0.6931472, %v2670_v1  ;;  %v1984_v29 = vpop.xlane.xlu1 %1983 }
 0x3ae   : > { %2671 = vlog2.f32 %v1984_v29 }
 0x3af   : > { %v2045_v46 = vsub.f32 %v3863_v42, %v2014_v35 }
 0x3b1   : > { %2061 = vst [vmem:[%s3929_s7] sm:$0xff] %v2045_v46 }
 0x3b2   : > { %v1932_v49 = vpop.xlane.xlu2 %1931 }
 0x3b3   : > { %v3933_v4 = vsub.f32 %v3877_v52, %v1932_v49 }
 0x3b4   : > { %v2672_v54 = vpop.eup %2671 }
 0x3b5   : > { %v2016_v39 = vmul.f32 0.6931472, %v2672_v54  ;;  %v1979_v28 = vmul.f32 1.442695, %v3933_v4 }
 0x3b7   : > { %v2046_v15 = vsub.f32 %v3870_v30, %v2016_v39  ;;  %2673 = vpow2.f32 %v1979_v28 }
 0x3b9   : > { %2062 = vst [vmem:[%s3929_s7 + $0x8] sm:$0xff] %v2046_v15 }
 0x3ba   : > { %v1986_v42 = vpop.xlane.xlu2 %1985 }
 0x3bb   : > { %2675 = vlog2.f32 %v1986_v42 }
 0x3bd   : > { %v2674_v38 = vpop.eup %2673  ;;  %v1988_v12 = vpop.xlane.xlu0 %1987 }
 0x3be   : > { %2677 = vlog2.f32 %v1988_v12  ;;  %2011 = vadd.xlane.f32.xlu0 %v2674_v38 }
 0x3c1   : > { %v2676_v37 = vpop.eup %2675 }
 0x3c2   : > { %v2018_v52 = vmul.f32 0.6931472, %v2676_v37 }
 0x3c4   : > { %v2678_v27 = vpop.eup %2677  ;;  %v2047_v48 = vsub.f32 %v3873_v11, %v2018_v52 }
 0x3c5   : > { %v2020_v19 = vmul.f32 0.6931472, %v2678_v27  ;;  %v1990_v59 = vpop.xlane.xlu1 %1989 }
 0x3c6   : > { %2063 = vst [vmem:[%s3929_s7 + $0x10] sm:$0xff] %v2047_v48  ;;  %2679 = vlog2.f32 %v1990_v59 }
 0x3c7   : > { %v2048_v30 = vsub.f32 %v3879_v57, %v2020_v19 }
 0x3c9   : > { %2064 = vst [vmem:[%s3929_s7 + $0x18] sm:$0xff] %v2048_v30 }
 0x3cc   : > { %v2680_v61 = vpop.eup %2679 }
 0x3cd   : > { %v2022_v20 = vmul.f32 0.6931472, %v2680_v61  ;;  %v1992_v14 = vpop.xlane.xlu2 %1991 }
 0x3ce   : > { %2681 = vlog2.f32 %v1992_v14 }
 0x3cf   : > { %v2049_v50 = vsub.f32 %v3883_v23, %v2022_v20 }
 0x3d1   : > { %2065 = vst [vmem:[%s3929_s7 + $0x20] sm:$0xff] %v2049_v50 }
 0x3d4   : > { %v2682_v10 = vpop.eup %2681 }
 0x3d5   : > { %v2024_v22 = vmul.f32 0.6931472, %v2682_v10  ;;  %v1994_v11 = vpop.xlane.xlu0 %1993 }
 0x3d6   : > { %2683 = vlog2.f32 %v1994_v11 }
 0x3d7   : > { %v2050_v0 = vsub.f32 %v3886_v5, %v2024_v22 }
 0x3d9   : > { %2066 = vst [vmem:[%s3929_s7 + $0x28] sm:$0xff] %v2050_v0 }
 0x3dc   : > { %v2684_v60 = vpop.eup %2683 }
 0x3dd   : > { %v2026_v6 = vmul.f32 0.6931472, %v2684_v60  ;;  %v1996_v57 = vpop.xlane.xlu1 %1995 }
 0x3de   : > { %2685 = vlog2.f32 %v1996_v57 }
 0x3df   : > { %v2051_v8 = vsub.f32 %v3890_v9, %v2026_v6 }
 0x3e1   : > { %2067 = vst [vmem:[%s3929_s7 + $0x30] sm:$0xff] %v2051_v8 }
 0x3e4   : > { %v2686_v18 = vpop.eup %2685 }
 0x3e5   : > { %v2028_v45 = vmul.f32 0.6931472, %v2686_v18  ;;  %v1998_v23 = vpop.xlane.xlu2 %1997 }
 0x3e6   : > { %2687 = vlog2.f32 %v1998_v23 }
 0x3e7   : > { %v2052_v41 = vsub.f32 %v3894_v63, %v2028_v45 }
 0x3e9   : > { %2068 = vst [vmem:[%s3929_s7 + $0x38] sm:$0xff] %v2052_v41 }
 0x3ec   : > { %v2688_v31 = vpop.eup %2687 }
 0x3ed   : > { %v2030_v33 = vmul.f32 0.6931472, %v2688_v31  ;;  %v2000_v5 = vpop.xlane.xlu0 %1999 }
 0x3ee   : > { %2689 = vlog2.f32 %v2000_v5 }
 0x3ef   : > { %v2053_v40 = vsub.f32 %v3898_v32, %v2030_v33 }
 0x3f1   : > { %2069 = vst [vmem:[%s3929_s7 + $0x40] sm:$0xff] %v2053_v40 }
 0x3f4   : > { %v2690_v17 = vpop.eup %2689 }
 0x3f5   : > { %v2032_v16 = vmul.f32 0.6931472, %v2690_v17  ;;  %v2002_v9 = vpop.xlane.xlu1 %2001 }
 0x3f6   : > { %2691 = vlog2.f32 %v2002_v9 }
 0x3f7   : > { %v2054_v24 = vsub.f32 %v3902_v51, %v2032_v16 }
 0x3f9   : > { %2070 = vst [vmem:[%s3929_s7 + $0x48] sm:$0xff] %v2054_v24 }
 0x3fc   : > { %v2692_v55 = vpop.eup %2691 }
 0x3fd   : > { %v2034_v63 = vmul.f32 0.6931472, %v2692_v55  ;;  %v2004_v34 = vpop.xlane.xlu2 %2003 }
 0x3fe   : > { %2693 = vlog2.f32 %v2004_v34 }
 0x3ff   : > { %v2055_v2 = vsub.f32 %v3906_v21, %v2034_v63 }
 0x401   : > { %2071 = vst [vmem:[%s3929_s7 + $0x50] sm:$0xff] %v2055_v2 }
 0x404   : > { %v2694_v13 = vpop.eup %2693 }
 0x405   : > { %v2036_v32 = vmul.f32 0.6931472, %v2694_v13  ;;  %v2006_v62 = vpop.xlane.xlu0 %2005 }
 0x406   : > { %2695 = vlog2.f32 %v2006_v62 }
 0x407   : > { %v2056_v36 = vsub.f32 %v3910_v44, %v2036_v32 }
 0x409   : > { %2072 = vst [vmem:[%s3929_s7 + $0x58] sm:$0xff] %v2056_v36 }
 0x40c   : > { %v2696_v43 = vpop.eup %2695 }
 0x40d   : > { %v2038_v51 = vmul.f32 0.6931472, %v2696_v43 }
 0x40f   : > { %v2057_v56 = vsub.f32 %v3914_v3, %v2038_v51 }
 0x411   : > { %2073 = vst [vmem:[%s3929_s7 + $0x60] sm:$0xff] %v2057_v56 }
 0x414   : > { %v2008_v26 = vpop.xlane.xlu1 %2007 }
 0x415   : > { %2697 = vlog2.f32 %v2008_v26 }
 0x41b   : > { %v2698_v21 = vpop.eup %2697 }
 0x41c   : > { %v2040_v25 = vmul.f32 0.6931472, %v2698_v21 }
 0x41e   : > { %v2058_v58 = vsub.f32 %v3918_v7, %v2040_v25 }
 0x41f   : > { %v2010_v47 = vpop.xlane.xlu2 %2009 }
 0x420   : > { %2074 = vst [vmem:[%s3929_s7 + $0x68] sm:$0xff] %v2058_v58  ;;  %2699 = vlog2.f32 %v2010_v47 }
 0x426   : > { %v2700_v44 = vpop.eup %2699 }
 0x427   : > { %v2042_v1 = vmul.f32 0.6931472, %v2700_v44 }
 0x429   : > { %v2059_v35 = vsub.f32 %v3922_v53, %v2042_v1 }
 0x42b   : > { %2075 = vst [vmem:[%s3929_s7 + $0x70] sm:$0xff] %v2059_v35 }
 0x431   : > { %v2012_v29 = vpop.xlane.xlu0 %2011 }
 0x432   : > { %2701 = vlog2.f32 %v2012_v29 }
 0x438   : > { %v2702_v3 = vpop.eup %2701 }
 0x439   : > { %v2044_v7 = vmul.f32 0.6931472, %v2702_v3 }
 0x43b   : > { %v2060_v46 = vsub.f32 %v3933_v4, %v2044_v7 }
 0x43d   : > { %2076 = vst [vmem:[%s3929_s7 + $0x78] sm:$0xff] %v2060_v46 }
 0x43e   : > { %2771 = shalt.err (!%p2768_p8)
}
 0x43f   : > { %s2824_s30 = smov 128   ;;  %s2825_s6 = smov 8  }
 0x440   : > { %2490 = dma.vmem_to_hbm [thread:$0]  (%p2894_p5), %s2091_s12, 2048, %s2093_s13, %s2078_s14, %s2824_s30, %s2824_s30, %s2825_s6  }
 0x441 PF: > { %p2502_p9 = scmp.ge.s32.totalorder %s2810_s21, 2  ;;  %s2107_s7 = sand.u32 1, %s2798_s18  }
 0x442   : > { %s2108_s8 = scalar_lea.sflag [#allocation4], %s2107_s7 }
 0x443   : > { %p2497_p10 = pnand %p2502_p9, %p2898_p6 }
 0x445   : > { %p2498_p11 = pneg %p2497_p10 }
 0x447   : > { %2793 = dma.done.wait (%p2498_p11), %s2108_s8, 2048  }
 0x448   : > { %2795 = vsyncadd (%p2498_p11), %s2108_s8, 4294965248  ;;  %p16_p12 = scmp.ge.s32.totalorder %s2881_s24, 4   ;;  %s4008_s18 = smov %s2802_s19 }
 0x449   : > { %s4009_s19 = smov %s2806_s20  ;;  %s4010_s20 = smov %s2892_s27 }
 0x44a   : > { %s4011_s21 = smov %s2881_s24  ;;  %18 = sbr.rel (!%p16_p12) target bundleno = 4 (0x4), region = 87 }
 0x44f   :  { %2114 = vsyncpa [#allocation3], 1 }
 0x450   :  { %2116 = vsyncpa [#allocation3 + $0x1], 1 }
 0x451   :  { %2117 = vsyncpa [#allocation4], 1 }
 0x452   :  { %2119 = vsyncpa [#allocation4 + $0x1], 1 }

</bundles_post_ra>
